<compile_context>
chip_gen: v6e
topology: v6e:2x2x1
jax: 0.10.0
libtpu: 0.0.40
codegen_flags: <defaults>
</compile_context>

<pallas_src>
import math
from functools import partial

import jax
import jax.numpy as jnp
from jax.experimental import pallas as pl
from jax.experimental.pallas import tpu as pltpu

IN_CHNLS = 9      # in_chans
EM_DIM = 16       # embed_dim
WBSET = 3         # wbset_num
HIDDEN = 4 * EM_DIM

# ------------------------- packed-weight row layout ---------------------------
# Matrix pack (bf16, shape (MAT_ROWS, 128)); every matrix stored transposed
# (out_features, in_features) so the kernel computes  y = W^T @ x  directly.
R_WIN, R_WQ, R_WK, R_WV, R_WO = 0, 16, 32, 48, 64
R_W1, R_W2, R_WOUT, R_WH = 80, 144, 160, 176
MAT_ROWS = 184

# Vector pack (f32, shape (VEC_ROWS, 1)); biases / LN params stored as columns
# so they broadcast over the lane (token) axis without any in-kernel relayout.
V_BIN, V_G1, V_BE1, V_G2, V_BE2 = 0, 16, 32, 48, 64
V_BM1, V_BM2, V_BOUT, V_BH = 80, 144, 160, 176
VEC_ROWS = 184


# ----------------------------- shared math helpers ----------------------------
def _gelu(x):
    # tanh approximation (EUP-friendly)
    return 0.5 * x * (1.0 + jnp.tanh(0.7978845608028654 * (x + 0.044715 * x * x * x)))


def _ln_channels(z, g, b, eps=1e-5):
    """LayerNorm over the channel (sublane) axis of a (C, HW) activation."""
    mu = jnp.mean(z, axis=0, keepdims=True)
    var = jnp.mean((z - mu) ** 2, axis=0, keepdims=True)
    return (z - mu) * jax.lax.rsqrt(var + eps) * g + b


def _softmax_lanes(s):
    """Softmax over the last (lane) axis, using the EUP approx reciprocal."""
    m = jnp.max(s, axis=-1, keepdims=True)
    e = jnp.exp(s - m)
    return e * pl.reciprocal(jnp.sum(e, axis=-1, keepdims=True), approx=True)


# --------------------------------- kernel -------------------------------------
def hist_kernel(x_ref, wm_ref, wv_ref, out_hist_ref, hist_w_ref):
    # Packed (transposed) weight matrices — bf16 operands for the MXU.
    w_in = wm_ref[R_WIN:R_WIN + EM_DIM, :IN_CHNLS]       # (EM, Cin)
    wq = wm_ref[R_WQ:R_WQ + EM_DIM, :EM_DIM]
    wk = wm_ref[R_WK:R_WK + EM_DIM, :EM_DIM]
    wv = wm_ref[R_WV:R_WV + EM_DIM, :EM_DIM]
    wo = wm_ref[R_WO:R_WO + EM_DIM, :EM_DIM]
    w1 = wm_ref[R_W1:R_W1 + HIDDEN, :EM_DIM]             # (HID, EM)
    w2 = wm_ref[R_W2:R_W2 + EM_DIM, :HIDDEN]             # (EM, HID)
    w_out = wm_ref[R_WOUT:R_WOUT + IN_CHNLS, :EM_DIM]    # (Cin, EM)
    w_h = wm_ref[R_WH:R_WH + WBSET, :EM_DIM].astype(jnp.float32)  # (WBSET, EM)

    # Biases / LN params — f32 columns, broadcast over the token/lane axis.
    b_in = wv_ref[V_BIN:V_BIN + EM_DIM]
    g1 = wv_ref[V_G1:V_G1 + EM_DIM]
    be1 = wv_ref[V_BE1:V_BE1 + EM_DIM]
    g2 = wv_ref[V_G2:V_G2 + EM_DIM]
    be2 = wv_ref[V_BE2:V_BE2 + EM_DIM]
    bm1 = wv_ref[V_BM1:V_BM1 + HIDDEN]
    bm2 = wv_ref[V_BM2:V_BM2 + EM_DIM]
    b_out = wv_ref[V_BOUT:V_BOUT + IN_CHNLS]
    b_h = wv_ref[V_BH:V_BH + WBSET]

    scale = 1.0 / math.sqrt(EM_DIM)
    dn_qk = (((0,), (0,)), ((), ()))   # contract the embed axis (no k.T copy)
    dn_pv = (((1,), (1,)), ((), ()))   # contract the key/token axis

    # Statically-unrolled batch block (bt images per grid step).
    for i in range(x_ref.shape[0]):
        x = x_ref[i].astype(jnp.bfloat16)                           # (Cin, HW)

        # InputProj: linear token projection + LeakyReLU(0.2)
        h = jnp.dot(w_in, x, preferred_element_type=jnp.float32) + b_in
        h = jnp.where(h > 0, h, 0.2 * h)                            # (EM, HW) f32

        # LN -> single-head self-attention -> residual
        hn = _ln_channels(h, g1, be1).astype(jnp.bfloat16)
        q = jnp.dot(wq, hn, preferred_element_type=jnp.float32).astype(jnp.bfloat16)
        k = jnp.dot(wk, hn, preferred_element_type=jnp.float32).astype(jnp.bfloat16)
        v = jnp.dot(wv, hn, preferred_element_type=jnp.float32).astype(jnp.bfloat16)
        s = jax.lax.dot_general(q, k, dn_qk,
                                preferred_element_type=jnp.float32) * scale
        p = _softmax_lanes(s).astype(jnp.bfloat16)                  # (HW, HW)
        a = jax.lax.dot_general(v, p, dn_pv,
                                preferred_element_type=jnp.float32)  # (EM, HW)
        a = jnp.dot(wo, a.astype(jnp.bfloat16),
                    preferred_element_type=jnp.float32)
        h = h + a

        # LN -> channel FFN (GELU) -> residual
        # TODO(synk): original 'TwoDCFF' token-mlp uses depthwise 3x3 convs on
        # the 2D histogram; approximated by a plain channel FFN (matches ref).
        hn2 = _ln_channels(h, g2, be2).astype(jnp.bfloat16)
        m = jnp.dot(w1, hn2, preferred_element_type=jnp.float32) + bm1
        m = _gelu(m).astype(jnp.bfloat16)
        m = jnp.dot(w2, m, preferred_element_type=jnp.float32) + bm2
        h = h + m

        # OutputProj back to histogram channels — lane-dense (Cin, HW) store.
        out = jnp.dot(w_out, h.astype(jnp.bfloat16),
                      preferred_element_type=jnp.float32) + b_out
        out_hist_ref[i] = out

        # WB-set weight head: mean-pool over tokens -> linear -> softmax.
        pooled = jnp.mean(h, axis=1, keepdims=True)                 # (EM, 1)
        logits = jnp.dot(w_h, pooled,
                         preferred_element_type=jnp.float32) + b_h  # (WBSET, 1)
        lm = jnp.max(logits, axis=0, keepdims=True)
        le = jnp.exp(logits - lm)
        hist_w_ref[i] = le * pl.reciprocal(
            jnp.sum(le, axis=0, keepdims=True), approx=True)


# ------------------------------ params & packing ------------------------------
def init_params(key):
    def lin(k, fin, fout):
        return jax.random.normal(k, (fin, fout), jnp.float32) / math.sqrt(fin)

    ks = jax.random.split(key, 16)
    return dict(
        w_in=lin(ks[0], IN_CHNLS, EM_DIM),
        b_in=0.01 * jax.random.normal(ks[1], (1, EM_DIM), jnp.float32),
        g1=jnp.ones((1, EM_DIM), jnp.float32), be1=jnp.zeros((1, EM_DIM), jnp.float32),
        wq=lin(ks[2], EM_DIM, EM_DIM), wk=lin(ks[3], EM_DIM, EM_DIM),
        wv=lin(ks[4], EM_DIM, EM_DIM), wo=lin(ks[5], EM_DIM, EM_DIM),
        g2=jnp.ones((1, EM_DIM), jnp.float32), be2=jnp.zeros((1, EM_DIM), jnp.float32),
        w1=lin(ks[6], EM_DIM, HIDDEN),
        bm1=0.01 * jax.random.normal(ks[7], (1, HIDDEN), jnp.float32),
        w2=lin(ks[8], HIDDEN, EM_DIM),
        bm2=0.01 * jax.random.normal(ks[9], (1, EM_DIM), jnp.float32),
        w_out=lin(ks[10], EM_DIM, IN_CHNLS),
        b_out=0.01 * jax.random.normal(ks[11], (1, IN_CHNLS), jnp.float32),
        w_h=lin(ks[12], EM_DIM, WBSET),
        b_h=0.01 * jax.random.normal(ks[13], (1, WBSET), jnp.float32),
    )


def pack_params(p):
    """Pack all weights into one bf16 matrix pack + one f32 vector pack."""
    M = jnp.zeros((MAT_ROWS, 128), jnp.float32)

    def put_mat(mat, row, w_t):
        r, c = w_t.shape
        return mat.at[row:row + r, :c].set(w_t)

    M = put_mat(M, R_WIN, p["w_in"].T)
    M = put_mat(M, R_WQ, p["wq"].T)
    M = put_mat(M, R_WK, p["wk"].T)
    M = put_mat(M, R_WV, p["wv"].T)
    M = put_mat(M, R_WO, p["wo"].T)
    M = put_mat(M, R_W1, p["w1"].T)
    M = put_mat(M, R_W2, p["w2"].T)
    M = put_mat(M, R_WOUT, p["w_out"].T)
    M = put_mat(M, R_WH, p["w_h"].T)

    V = jnp.zeros((VEC_ROWS, 1), jnp.float32)

    def put_vec(vec, row, v):
        v = v.reshape(-1, 1)
        return vec.at[row:row + v.shape[0]].set(v)

    V = put_vec(V, V_BIN, p["b_in"])
    V = put_vec(V, V_G1, p["g1"])
    V = put_vec(V, V_BE1, p["be1"])
    V = put_vec(V, V_G2, p["g2"])
    V = put_vec(V, V_BE2, p["be2"])
    V = put_vec(V, V_BM1, p["bm1"])
    V = put_vec(V, V_BM2, p["bm2"])
    V = put_vec(V, V_BOUT, p["b_out"])
    V = put_vec(V, V_BH, p["b_h"])
    return M.astype(jnp.bfloat16), V


def _pick_bt(B):
    # Keep >=2 grid steps (megacore / v7x: 2 TCs) while amortizing the ~0.35us
    # per-grid-step overhead for larger batches.
    for bt in (8, 4, 2, 1):
        if B % bt == 0 and B // bt >= 2:
            return bt
    return B  # B == 1


# --------------------------------- wrapper ------------------------------------
@partial(jax.jit, static_argnames=("bt",))
def hist_net_forward(x_nchw, params, bt=None):
    B, C, H, W = x_nchw.shape
    assert C == IN_CHNLS
    HW = H * W
    x_tok = x_nchw.reshape(B, C, HW)          # NCHW kept; bins on the lane axis
    wmat, wvec = pack_params(params)

    if bt is None:
        bt = _pick_bt(B)
    assert B % bt == 0

    out_hist_tok, hist_w = pl.pallas_call(
        hist_kernel,
        grid=(B // bt,),
        in_specs=[
            pl.BlockSpec((bt, C, HW), lambda b: (b, 0, 0)),
            pl.BlockSpec((MAT_ROWS, 128), lambda b: (0, 0)),
            pl.BlockSpec((VEC_ROWS, 1), lambda b: (0, 0)),
        ],
        out_specs=[
            pl.BlockSpec((bt, C, HW), lambda b: (b, 0, 0)),
            pl.BlockSpec((bt, WBSET, 1), lambda b: (b, 0, 0)),
        ],
        out_shape=[
            jax.ShapeDtypeStruct((B, C, HW), jnp.float32),
            jax.ShapeDtypeStruct((B, WBSET, 1), jnp.float32),
        ],
        compiler_params=pltpu.CompilerParams(dimension_semantics=("parallel",)),
    )(x_tok, wmat, wvec)

    out_hist = out_hist_tok.reshape(B, C, H, W)   # already NCHW — free reshape
    hist_W = hist_w.reshape(B, WBSET)
    return out_hist, hist_W


# ------------------------------ pure-JAX reference -----------------------------
def _layernorm(z, g, b, eps=1e-5):
    mu = jnp.mean(z, axis=-1, keepdims=True)
    var = jnp.mean((z - mu) ** 2, axis=-1, keepdims=True)
    return (z - mu) * jax.lax.rsqrt(var + eps) * g + b


def _softmax_lastdim(x):
    m = jnp.max(x, axis=-1, keepdims=True)
    e = jnp.exp(x - m)
    return e / jnp.sum(e, axis=-1, keepdims=True)


def hist_net_reference(x_nchw, p):
    B, C, H, W = x_nchw.shape
    x = jnp.transpose(x_nchw, (0, 2, 3, 1)).reshape(B, H * W, C)
    h = x @ p["w_in"] + p["b_in"]
    h = jnp.where(h > 0, h, 0.2 * h)
    hn = _layernorm(h, p["g1"], p["be1"])
    q, k, v = hn @ p["wq"], hn @ p["wk"], hn @ p["wv"]
    attn = _softmax_lastdim(jnp.einsum("bqd,bkd->bqk", q, k) / math.sqrt(EM_DIM))
    a = jnp.einsum("bqk,bkd->bqd", attn, v) @ p["wo"]
    h = h + a
    hn2 = _layernorm(h, p["g2"], p["be2"])
    m = _gelu(hn2 @ p["w1"] + p["bm1"]) @ p["w2"] + p["bm2"]
    h = h + m
    out = h @ p["w_out"] + p["b_out"]
    out_hist = out.reshape(B, H, W, C).transpose(0, 3, 1, 2)
    pooled = jnp.mean(h, axis=1)
    hist_W = _softmax_lastdim(pooled @ p["w_h"] + p["b_h"])
    return out_hist, hist_W


if __name__ == "__main__":
    key = jax.random.PRNGKey(0)
    kx, kp = jax.random.split(key)
    B, H, W = 2, 16, 16
    x = jax.random.uniform(kx, (B, IN_CHNLS, H, W), jnp.float32)
    params = init_params(kp)

    out_hist, hist_W = hist_net_forward(x, params)
    jax.block_until_ready((out_hist, hist_W))

    ref_hist, ref_W = hist_net_reference(x, params)
    assert out_hist.shape == (B, IN_CHNLS, H, W)
    assert hist_W.shape == (B, WBSET)
    assert bool(jnp.all(jnp.isfinite(out_hist))) and bool(jnp.all(jnp.isfinite(hist_W)))
    assert jnp.allclose(out_hist, ref_hist, atol=5e-2, rtol=5e-2)
    assert jnp.allclose(hist_W, ref_W, atol=5e-2, rtol=5e-2)
    print("KERNEL_OK")
</pallas_src>

<mosaic_0001>
module attributes {stable_mosaic.version = 11 : i64} {
  func.func @hist_kernel(%arg0: i32, %arg1: memref<1x9x256xf32, #tpu.memory_space<vmem>>, %arg2: memref<184x128xbf16, #tpu.memory_space<vmem>>, %arg3: memref<184x1xf32, #tpu.memory_space<vmem>>, %arg4: memref<1x9x256xf32, #tpu.memory_space<vmem>>, %arg5: memref<1x3x1xf32, #tpu.memory_space<vmem>>) attributes {dimension_semantics = [#tpu.dimension_semantics<parallel>], iteration_bounds = array<i64: 2>, scalar_prefetch = 0 : i64, scratch_operands = 0 : i64, tpu.core_type = #tpu.core_type<tc>, window_params = [{transform_indices = @transform_0, window_bounds = array<i64: 1, 9, 256>}, {pipeline_mode = #tpu.pipeline_mode<synchronous>, transform_indices = @transform_1, window_bounds = array<i64: 184, 128>}, {pipeline_mode = #tpu.pipeline_mode<synchronous>, transform_indices = @transform_2, window_bounds = array<i64: 184, 1>}, {transform_indices = @transform_3, window_bounds = array<i64: 1, 9, 256>}, {transform_indices = @transform_4, window_bounds = array<i64: 1, 3, 1>}]} {
    %c0 = arith.constant 0 : index
    %c0_0 = arith.constant 0 : index
    %0 = vector.load %arg2[%c0, %c0_0] : memref<184x128xbf16, #tpu.memory_space<vmem>>, vector<16x9xbf16>
    %c16 = arith.constant 16 : index
    %c0_1 = arith.constant 0 : index
    %1 = vector.load %arg2[%c16, %c0_1] : memref<184x128xbf16, #tpu.memory_space<vmem>>, vector<16x16xbf16>
    %c32 = arith.constant 32 : index
    %c0_2 = arith.constant 0 : index
    %2 = vector.load %arg2[%c32, %c0_2] : memref<184x128xbf16, #tpu.memory_space<vmem>>, vector<16x16xbf16>
    %c48 = arith.constant 48 : index
    %c0_3 = arith.constant 0 : index
    %3 = vector.load %arg2[%c48, %c0_3] : memref<184x128xbf16, #tpu.memory_space<vmem>>, vector<16x16xbf16>
    %c64 = arith.constant 64 : index
    %c0_4 = arith.constant 0 : index
    %4 = vector.load %arg2[%c64, %c0_4] : memref<184x128xbf16, #tpu.memory_space<vmem>>, vector<16x16xbf16>
    %c80 = arith.constant 80 : index
    %c0_5 = arith.constant 0 : index
    %5 = vector.load %arg2[%c80, %c0_5] : memref<184x128xbf16, #tpu.memory_space<vmem>>, vector<64x16xbf16>
    %c144 = arith.constant 144 : index
    %c0_6 = arith.constant 0 : index
    %6 = vector.load %arg2[%c144, %c0_6] : memref<184x128xbf16, #tpu.memory_space<vmem>>, vector<16x64xbf16>
    %c160 = arith.constant 160 : index
    %c0_7 = arith.constant 0 : index
    %7 = vector.load %arg2[%c160, %c0_7] : memref<184x128xbf16, #tpu.memory_space<vmem>>, vector<9x16xbf16>
    %c176 = arith.constant 176 : index
    %c0_8 = arith.constant 0 : index
    %8 = vector.load %arg2[%c176, %c0_8] : memref<184x128xbf16, #tpu.memory_space<vmem>>, vector<3x16xbf16>
    %9 = arith.extf %8 : vector<3x16xbf16> to vector<3x16xf32>
    %c0_9 = arith.constant 0 : index
    %c0_10 = arith.constant 0 : index
    %10 = vector.load %arg3[%c0_9, %c0_10] : memref<184x1xf32, #tpu.memory_space<vmem>>, vector<16x1xf32>
    %c16_11 = arith.constant 16 : index
    %c0_12 = arith.constant 0 : index
    %11 = vector.load %arg3[%c16_11, %c0_12] : memref<184x1xf32, #tpu.memory_space<vmem>>, vector<16x1xf32>
    %c32_13 = arith.constant 32 : index
    %c0_14 = arith.constant 0 : index
    %12 = vector.load %arg3[%c32_13, %c0_14] : memref<184x1xf32, #tpu.memory_space<vmem>>, vector<16x1xf32>
    %c48_15 = arith.constant 48 : index
    %c0_16 = arith.constant 0 : index
    %13 = vector.load %arg3[%c48_15, %c0_16] : memref<184x1xf32, #tpu.memory_space<vmem>>, vector<16x1xf32>
    %c64_17 = arith.constant 64 : index
    %c0_18 = arith.constant 0 : index
    %14 = vector.load %arg3[%c64_17, %c0_18] : memref<184x1xf32, #tpu.memory_space<vmem>>, vector<16x1xf32>
    %c80_19 = arith.constant 80 : index
    %c0_20 = arith.constant 0 : index
    %15 = vector.load %arg3[%c80_19, %c0_20] : memref<184x1xf32, #tpu.memory_space<vmem>>, vector<64x1xf32>
    %c144_21 = arith.constant 144 : index
    %c0_22 = arith.constant 0 : index
    %16 = vector.load %arg3[%c144_21, %c0_22] : memref<184x1xf32, #tpu.memory_space<vmem>>, vector<16x1xf32>
    %c160_23 = arith.constant 160 : index
    %c0_24 = arith.constant 0 : index
    %17 = vector.load %arg3[%c160_23, %c0_24] : memref<184x1xf32, #tpu.memory_space<vmem>>, vector<9x1xf32>
    %c176_25 = arith.constant 176 : index
    %c0_26 = arith.constant 0 : index
    %18 = vector.load %arg3[%c176_25, %c0_26] : memref<184x1xf32, #tpu.memory_space<vmem>>, vector<3x1xf32>
    %c0_27 = arith.constant 0 : index
    %c0_28 = arith.constant 0 : index
    %c0_29 = arith.constant 0 : index
    %19 = vector.load %arg1[%c0_27, %c0_28, %c0_29] : memref<1x9x256xf32, #tpu.memory_space<vmem>>, vector<1x9x256xf32>
    %20 = vector.shape_cast %19 : vector<1x9x256xf32> to vector<9x256xf32>
    %21 = arith.truncf %20 : vector<9x256xf32> to vector<9x256xbf16>
    %cst = arith.constant dense<0.000000e+00> : vector<16x256xf32>
    %22 = tpu.matmul %0, %21, %cst {dimension_numbers = #tpu.dot_dimension_numbers<[1], [0], [0], [1], [0, 0, 1, 1], [], []>} : vector<16x9xbf16>, vector<9x256xbf16>, vector<16x256xf32> -> vector<16x256xf32>
    %23 = vector.broadcast %10 : vector<16x1xf32> to vector<16x256xf32>
    %24 = arith.addf %22, %23 : vector<16x256xf32>
    %cst_30 = arith.constant 0.000000e+00 : f32
    %25 = vector.broadcast %cst_30 : f32 to vector<16x256xf32>
    %26 = arith.cmpf ogt, %24, %25 : vector<16x256xf32>
    %cst_31 = arith.constant 2.000000e-01 : f32
    %27 = vector.broadcast %cst_31 : f32 to vector<16x256xf32>
    %28 = arith.mulf %27, %24 : vector<16x256xf32>
    %29 = arith.select %26, %24, %28 : vector<16x256xi1>, vector<16x256xf32>
    %cst_32 = arith.constant dense<0.000000e+00> : vector<256xf32>
    %30 = vector.multi_reduction <add>, %29, %cst_32 [0] : vector<16x256xf32> to vector<256xf32>
    %31 = vector.shape_cast %30 : vector<256xf32> to vector<1x256xf32>
    %cst_33 = arith.constant 1.600000e+01 : f32
    %32 = vector.broadcast %cst_33 : f32 to vector<1x256xf32>
    %33 = arith.divf %31, %32 : vector<1x256xf32>
    %34 = vector.broadcast %33 : vector<1x256xf32> to vector<16x256xf32>
    %35 = arith.subf %29, %34 : vector<16x256xf32>
    %36 = arith.mulf %35, %35 : vector<16x256xf32>
    %cst_34 = arith.constant dense<0.000000e+00> : vector<256xf32>
    %37 = vector.multi_reduction <add>, %36, %cst_34 [0] : vector<16x256xf32> to vector<256xf32>
    %38 = vector.shape_cast %37 : vector<256xf32> to vector<1x256xf32>
    %cst_35 = arith.constant 1.600000e+01 : f32
    %39 = vector.broadcast %cst_35 : f32 to vector<1x256xf32>
    %40 = arith.divf %38, %39 : vector<1x256xf32>
    %41 = vector.broadcast %33 : vector<1x256xf32> to vector<16x256xf32>
    %42 = arith.subf %29, %41 : vector<16x256xf32>
    %cst_36 = arith.constant 9.99999974E-6 : f32
    %43 = vector.broadcast %cst_36 : f32 to vector<1x256xf32>
    %44 = arith.addf %40, %43 : vector<1x256xf32>
    %45 = math.rsqrt %44 : vector<1x256xf32>
    %46 = vector.broadcast %45 : vector<1x256xf32> to vector<16x256xf32>
    %47 = arith.mulf %42, %46 : vector<16x256xf32>
    %48 = vector.broadcast %11 : vector<16x1xf32> to vector<16x256xf32>
    %49 = arith.mulf %47, %48 : vector<16x256xf32>
    %50 = vector.broadcast %12 : vector<16x1xf32> to vector<16x256xf32>
    %51 = arith.addf %49, %50 : vector<16x256xf32>
    %52 = arith.truncf %51 : vector<16x256xf32> to vector<16x256xbf16>
    %cst_37 = arith.constant dense<0.000000e+00> : vector<16x256xf32>
    %53 = tpu.matmul %1, %52, %cst_37 {dimension_numbers = #tpu.dot_dimension_numbers<[1], [0], [0], [1], [0, 0, 1, 1], [], []>} : vector<16x16xbf16>, vector<16x256xbf16>, vector<16x256xf32> -> vector<16x256xf32>
    %54 = arith.truncf %53 : vector<16x256xf32> to vector<16x256xbf16>
    %cst_38 = arith.constant dense<0.000000e+00> : vector<16x256xf32>
    %55 = tpu.matmul %2, %52, %cst_38 {dimension_numbers = #tpu.dot_dimension_numbers<[1], [0], [0], [1], [0, 0, 1, 1], [], []>} : vector<16x16xbf16>, vector<16x256xbf16>, vector<16x256xf32> -> vector<16x256xf32>
    %56 = arith.truncf %55 : vector<16x256xf32> to vector<16x256xbf16>
    %cst_39 = arith.constant dense<0.000000e+00> : vector<16x256xf32>
    %57 = tpu.matmul %3, %52, %cst_39 {dimension_numbers = #tpu.dot_dimension_numbers<[1], [0], [0], [1], [0, 0, 1, 1], [], []>} : vector<16x16xbf16>, vector<16x256xbf16>, vector<16x256xf32> -> vector<16x256xf32>
    %58 = arith.truncf %57 : vector<16x256xf32> to vector<16x256xbf16>
    %cst_40 = arith.constant dense<0.000000e+00> : vector<256x256xf32>
    %59 = tpu.matmul %54, %56, %cst_40 {dimension_numbers = #tpu.dot_dimension_numbers<[0], [0], [1], [1], [0, 1, 1, 1], [], []>} : vector<16x256xbf16>, vector<16x256xbf16>, vector<256x256xf32> -> vector<256x256xf32>
    %cst_41 = arith.constant 2.500000e-01 : f32
    %60 = vector.broadcast %cst_41 : f32 to vector<256x256xf32>
    %61 = arith.mulf %59, %60 : vector<256x256xf32>
    %cst_42 = arith.constant dense<0xFF800000> : vector<256xf32>
    %62 = vector.multi_reduction <maximumf>, %61, %cst_42 [1] : vector<256x256xf32> to vector<256xf32>
    %63 = vector.shape_cast %62 : vector<256xf32> to vector<256x1xf32>
    %64 = vector.broadcast %63 : vector<256x1xf32> to vector<256x256xf32>
    %65 = arith.subf %61, %64 : vector<256x256xf32>
    %66 = math.exp %65 : vector<256x256xf32>
    %cst_43 = arith.constant dense<0.000000e+00> : vector<256xf32>
    %67 = vector.multi_reduction <add>, %66, %cst_43 [1] : vector<256x256xf32> to vector<256xf32>
    %68 = vector.shape_cast %67 : vector<256xf32> to vector<256x1xf32>
    %69 = tpu.reciprocal %68 {approx = true} : vector<256x1xf32> -> vector<256x1xf32>
    %70 = vector.broadcast %69 : vector<256x1xf32> to vector<256x256xf32>
    %71 = arith.mulf %66, %70 : vector<256x256xf32>
    %72 = arith.truncf %71 : vector<256x256xf32> to vector<256x256xbf16>
    %cst_44 = arith.constant dense<0.000000e+00> : vector<16x256xf32>
    %73 = tpu.matmul %58, %72, %cst_44 {dimension_numbers = #tpu.dot_dimension_numbers<[1], [1], [0], [0], [0, 0, 1, 0], [], []>} : vector<16x256xbf16>, vector<256x256xbf16>, vector<16x256xf32> -> vector<16x256xf32>
    %74 = arith.truncf %73 : vector<16x256xf32> to vector<16x256xbf16>
    %cst_45 = arith.constant dense<0.000000e+00> : vector<16x256xf32>
    %75 = tpu.matmul %4, %74, %cst_45 {dimension_numbers = #tpu.dot_dimension_numbers<[1], [0], [0], [1], [0, 0, 1, 1], [], []>} : vector<16x16xbf16>, vector<16x256xbf16>, vector<16x256xf32> -> vector<16x256xf32>
    %76 = arith.addf %29, %75 : vector<16x256xf32>
    %cst_46 = arith.constant dense<0.000000e+00> : vector<256xf32>
    %77 = vector.multi_reduction <add>, %76, %cst_46 [0] : vector<16x256xf32> to vector<256xf32>
    %78 = vector.shape_cast %77 : vector<256xf32> to vector<1x256xf32>
    %cst_47 = arith.constant 1.600000e+01 : f32
    %79 = vector.broadcast %cst_47 : f32 to vector<1x256xf32>
    %80 = arith.divf %78, %79 : vector<1x256xf32>
    %81 = vector.broadcast %80 : vector<1x256xf32> to vector<16x256xf32>
    %82 = arith.subf %76, %81 : vector<16x256xf32>
    %83 = arith.mulf %82, %82 : vector<16x256xf32>
    %cst_48 = arith.constant dense<0.000000e+00> : vector<256xf32>
    %84 = vector.multi_reduction <add>, %83, %cst_48 [0] : vector<16x256xf32> to vector<256xf32>
    %85 = vector.shape_cast %84 : vector<256xf32> to vector<1x256xf32>
    %cst_49 = arith.constant 1.600000e+01 : f32
    %86 = vector.broadcast %cst_49 : f32 to vector<1x256xf32>
    %87 = arith.divf %85, %86 : vector<1x256xf32>
    %88 = vector.broadcast %80 : vector<1x256xf32> to vector<16x256xf32>
    %89 = arith.subf %76, %88 : vector<16x256xf32>
    %cst_50 = arith.constant 9.99999974E-6 : f32
    %90 = vector.broadcast %cst_50 : f32 to vector<1x256xf32>
    %91 = arith.addf %87, %90 : vector<1x256xf32>
    %92 = math.rsqrt %91 : vector<1x256xf32>
    %93 = vector.broadcast %92 : vector<1x256xf32> to vector<16x256xf32>
    %94 = arith.mulf %89, %93 : vector<16x256xf32>
    %95 = vector.broadcast %13 : vector<16x1xf32> to vector<16x256xf32>
    %96 = arith.mulf %94, %95 : vector<16x256xf32>
    %97 = vector.broadcast %14 : vector<16x1xf32> to vector<16x256xf32>
    %98 = arith.addf %96, %97 : vector<16x256xf32>
    %99 = arith.truncf %98 : vector<16x256xf32> to vector<16x256xbf16>
    %cst_51 = arith.constant dense<0.000000e+00> : vector<64x256xf32>
    %100 = tpu.matmul %5, %99, %cst_51 {dimension_numbers = #tpu.dot_dimension_numbers<[1], [0], [0], [1], [0, 0, 1, 1], [], []>} : vector<64x16xbf16>, vector<16x256xbf16>, vector<64x256xf32> -> vector<64x256xf32>
    %101 = vector.broadcast %15 : vector<64x1xf32> to vector<64x256xf32>
    %102 = arith.addf %100, %101 : vector<64x256xf32>
    %cst_52 = arith.constant 5.000000e-01 : f32
    %103 = vector.broadcast %cst_52 : f32 to vector<64x256xf32>
    %104 = arith.mulf %103, %102 : vector<64x256xf32>
    %cst_53 = arith.constant 4.471500e-02 : f32
    %105 = vector.broadcast %cst_53 : f32 to vector<64x256xf32>
    %106 = arith.mulf %105, %102 : vector<64x256xf32>
    %107 = arith.mulf %106, %102 : vector<64x256xf32>
    %108 = arith.mulf %107, %102 : vector<64x256xf32>
    %109 = arith.addf %102, %108 : vector<64x256xf32>
    %cst_54 = arith.constant 0.797884583 : f32
    %110 = vector.broadcast %cst_54 : f32 to vector<64x256xf32>
    %111 = arith.mulf %110, %109 : vector<64x256xf32>
    %112 = math.tanh %111 : vector<64x256xf32>
    %cst_55 = arith.constant 1.000000e+00 : f32
    %113 = vector.broadcast %cst_55 : f32 to vector<64x256xf32>
    %114 = arith.addf %113, %112 : vector<64x256xf32>
    %115 = arith.mulf %104, %114 : vector<64x256xf32>
    %116 = arith.truncf %115 : vector<64x256xf32> to vector<64x256xbf16>
    %cst_56 = arith.constant dense<0.000000e+00> : vector<16x256xf32>
    %117 = tpu.matmul %6, %116, %cst_56 {dimension_numbers = #tpu.dot_dimension_numbers<[1], [0], [0], [1], [0, 0, 1, 1], [], []>} : vector<16x64xbf16>, vector<64x256xbf16>, vector<16x256xf32> -> vector<16x256xf32>
    %118 = vector.broadcast %16 : vector<16x1xf32> to vector<16x256xf32>
    %119 = arith.addf %117, %118 : vector<16x256xf32>
    %120 = arith.addf %76, %119 : vector<16x256xf32>
    %121 = arith.truncf %120 : vector<16x256xf32> to vector<16x256xbf16>
    %cst_57 = arith.constant dense<0.000000e+00> : vector<9x256xf32>
    %122 = tpu.matmul %7, %121, %cst_57 {dimension_numbers = #tpu.dot_dimension_numbers<[1], [0], [0], [1], [0, 0, 1, 1], [], []>} : vector<9x16xbf16>, vector<16x256xbf16>, vector<9x256xf32> -> vector<9x256xf32>
    %123 = vector.broadcast %17 : vector<9x1xf32> to vector<9x256xf32>
    %124 = arith.addf %122, %123 : vector<9x256xf32>
    %c0_58 = arith.constant 0 : index
    %c0_59 = arith.constant 0 : index
    %c0_60 = arith.constant 0 : index
    %125 = vector.load %arg4[%c0_58, %c0_59, %c0_60] : memref<1x9x256xf32, #tpu.memory_space<vmem>>, vector<1x9x256xf32>
    %126 = vector.shape_cast %125 : vector<1x9x256xf32> to vector<9x256xf32>
    %127 = vector.shape_cast %124 : vector<9x256xf32> to vector<1x9x256xf32>
    tpu.vector_store %arg4[%c0_58, %c0_59, %c0_60], %127 {strides = array<i32>} : memref<1x9x256xf32, #tpu.memory_space<vmem>>, vector<1x9x256xf32>,
    %cst_61 = arith.constant dense<0.000000e+00> : vector<16xf32>
    %128 = vector.multi_reduction <add>, %120, %cst_61 [1] : vector<16x256xf32> to vector<16xf32>
    %129 = vector.shape_cast %128 : vector<16xf32> to vector<16x1xf32>
    %cst_62 = arith.constant 2.560000e+02 : f32
    %130 = vector.broadcast %cst_62 : f32 to vector<16x1xf32>
    %131 = arith.divf %129, %130 : vector<16x1xf32>
    %cst_63 = arith.constant dense<0.000000e+00> : vector<3x1xf32>
    %132 = tpu.matmul %9, %131, %cst_63 {dimension_numbers = #tpu.dot_dimension_numbers<[1], [0], [0], [1], [0, 0, 1, 1], [], []>} : vector<3x16xf32>, vector<16x1xf32>, vector<3x1xf32> -> vector<3x1xf32>
    %133 = arith.addf %132, %18 : vector<3x1xf32>
    %cst_64 = arith.constant dense<0xFF800000> : vector<1xf32>
    %134 = vector.multi_reduction <maximumf>, %133, %cst_64 [0] : vector<3x1xf32> to vector<1xf32>
    %135 = vector.shape_cast %134 : vector<1xf32> to vector<1x1xf32>
    %136 = vector.broadcast %135 : vector<1x1xf32> to vector<3x1xf32>
    %137 = arith.subf %133, %136 : vector<3x1xf32>
    %138 = math.exp %137 : vector<3x1xf32>
    %cst_65 = arith.constant dense<0.000000e+00> : vector<1xf32>
    %139 = vector.multi_reduction <add>, %138, %cst_65 [0] : vector<3x1xf32> to vector<1xf32>
    %140 = vector.shape_cast %139 : vector<1xf32> to vector<1x1xf32>
    %141 = tpu.reciprocal %140 {approx = true} : vector<1x1xf32> -> vector<1x1xf32>
    %142 = vector.broadcast %141 : vector<1x1xf32> to vector<3x1xf32>
    %143 = arith.mulf %138, %142 : vector<3x1xf32>
    %c0_66 = arith.constant 0 : index
    %c0_67 = arith.constant 0 : index
    %c0_68 = arith.constant 0 : index
    %144 = vector.load %arg5[%c0_66, %c0_67, %c0_68] : memref<1x3x1xf32, #tpu.memory_space<vmem>>, vector<1x3x1xf32>
    %145 = vector.shape_cast %144 : vector<1x3x1xf32> to vector<3x1xf32>
    %146 = vector.shape_cast %143 : vector<3x1xf32> to vector<1x3x1xf32>
    tpu.vector_store %arg5[%c0_66, %c0_67, %c0_68], %146 {strides = array<i32>} : memref<1x3x1xf32, #tpu.memory_space<vmem>>, vector<1x3x1xf32>,
    return
  }
  func.func @transform_0(%arg0: i32) -> (i32, i32, i32) {
    %c0_i32 = arith.constant 0 : i32
    %c0_i32_0 = arith.constant 0 : i32
    %c0_i32_1 = arith.constant 0 : i32
    return %arg0, %c0_i32, %c0_i32_0 : i32, i32, i32
  }
  func.func @transform_1(%arg0: i32) -> (i32, i32) {
    %c0_i32 = arith.constant 0 : i32
    %c0_i32_0 = arith.constant 0 : i32
    %c0_i32_1 = arith.constant 0 : i32
    return %c0_i32, %c0_i32_0 : i32, i32
  }
  func.func @transform_2(%arg0: i32) -> (i32, i32) {
    %c0_i32 = arith.constant 0 : i32
    %c0_i32_0 = arith.constant 0 : i32
    %c0_i32_1 = arith.constant 0 : i32
    return %c0_i32, %c0_i32_0 : i32, i32
  }
  func.func @transform_3(%arg0: i32) -> (i32, i32, i32) {
    %c0_i32 = arith.constant 0 : i32
    %c0_i32_0 = arith.constant 0 : i32
    %c0_i32_1 = arith.constant 0 : i32
    return %arg0, %c0_i32, %c0_i32_0 : i32, i32, i32
  }
  func.func @transform_4(%arg0: i32) -> (i32, i32, i32) {
    %c0_i32 = arith.constant 0 : i32
    %c0_i32_0 = arith.constant 0 : i32
    %c0_i32_1 = arith.constant 0 : i32
    return %arg0, %c0_i32, %c0_i32_0 : i32, i32, i32
  }
}

</mosaic_0001>

<bundles_post_ra>
// kernel: hist_net_forward.1
= control target key start
LH: loop header
LB: loop body
LE: loop exit
PB: predicated region body
PF: predicated region fallthrough
CT: control target
= control target key end

     0   :  { %s2593_s15 = smov 0   ;;  %s3545_s0 = inlined_call_operand.vmem [shape: f32[2,9,256], index: 0, kind: input, shape index: {}]   ;;  %s3546_s1 = inlined_call_operand.vmem [shape: bf16[184,128], index: 1, kind: input, shape index: {}]   ;;  %s3547_s2 = inlined_call_operand.vmem [shape: f32[184,1], index: 2, kind: input, shape index: {}]   ;;  %s3548_s3 = inlined_call_operand.vmem [shape: f32[2,9,256], index: 3, kind: output, shape index: {0}]   ;;  %s3549_s4 = inlined_call_operand.vmem [shape: f32[2,3,1], index: 4, kind: output, shape index: {1}]  }
   0x1 LB: > { %s2232_s16 = sadd.s32 4294967295, %s2562_s15   ;;  %p2236_p0 = scmp.ge.s32.totalorder %s2562_s15, 1  ;;  %s2562_s15 = sphi %s2593_s15, %s15_s15  }
   0x2   : > { %p165_p1 = scmp.lt.s32.totalorder %s2562_s15, 3 }
   0x4   : > { %p166_p2 = pnand %p2236_p0, %p165_p1 }
   0x6   : > { %169 = sbr.rel (%p166_p2) target bundleno = 2707 (0xa93), region = 32 }
   0xb   : > { %p195_p3 = scmp.lt.s32.totalorder %s2232_s16, 1  ;;  %vm282_vm0 = vcmask 1043456   ;;  %v3550_v0 = vmov 0   ;;  %v234_v1 = vld [vmem:[%s3547_s2] sm:$0xff]  ;;  %vm283_vm1 = vcmask 1044480   ;;  %v2565_v2 = vmov 65535  }
   0xc   : > { %324 = vmatprep.mubr.bf16.mxu0 %v3550_v0  ;;  %2307 = vset.pattern.permute.xlu0 %v3550_v0  ;;  %v284_v3 = vsel %vm282_vm0, 4294967295, %v2565_v2  ;;  %v235_v4 = vld [vmem:[%s3547_s2 + $0x8] sm:$0xff]  ;;  %v236_v5 = vld [vmem:[%s3547_s2 + $0x10] sm:$0xff]  ;;  %v237_v6 = vld [vmem:[%s3547_s2 + $0x18] sm:$0xff]  ;;  %vm278_vm2 = vcmask 72704   ;;  %vm431_vm7 = vcmask 130048  }
   0xd   : > { %s3648_s16 = smov (!%p195_p3, %s2232_s16), 1  ;;  %2308 = vset.pattern.permute.xlu1 %v3550_v0  ;;  %467 = vmatprep.mubr.bf16.mxu1 %v3550_v0  ;;  %v285_v9 = vsel %vm283_vm1, %v284_v3, 0  ;;  %v238_v11 = vld [vmem:[%s3547_s2 + $0x20] sm:$0xff]  ;;  %v239_v14 = vld [vmem:[%s3547_s2 + $0x28] sm:$0xff]  ;;  %vm1925_vm8 = vcmask 523264   ;;  %vm2567_vm9 = vmmov 0  }
   0xe   : > { %265 = vperm.xlu0 %2307, %v234_v1   ;;  %s2283_s23 = sshll.u32 %s3648_s16, 5  ;;  %398 = vperm.xlu1 %2308, %v236_v5   ;;  %v2309_v17 = vld [vmem:[%s3546_s1] sm:$0xff]   ;;  %vm2125_vm10 = vcmask 2048  }
   0xf   : > { %s199_s28 = scalar_lea.vmem %s3545_s0, %s2283_s23  ;;  %s204_s21 = scalar_lea.vmem %s3548_s3, %s2283_s23 }
  0x10   : > { %v258_v7 = vld [vmem:[%s199_s28 + $0x8] sm:$0xff]  ;;  %v260_v8 = vld [vmem:[%s199_s28 + $0x18] sm:$0x1]  ;;  %v257_v10 = vld [vmem:[%s199_s28] sm:$0xff]  ;;  %s2241_s23 = sshll.u32 %s3648_s16, 2 }
  0x11   : > { %v262_v12 = vpack.c.bf16 %v260_v8, %v258_v7  ;;  %v259_v13 = vld [vmem:[%s199_s28 + $0x10] sm:$0x1]  ;;  %s208_s27 = scalar_lea.vmem %s3549_s4, %s2241_s23 }
  0x12   : > { %270 = vperm.xlu0 %2307, %v235_v4   ;;  %v261_v15 = vpack.c.bf16 %v259_v13, %v257_v10  ;;  %403 = vperm.xlu1 %2308, %v237_v6  }
  0x13   : > { %v290_v16 = vand.u32 %v285_v9, %v262_v12 }
  0x14   : > { %v287_v18 = vand.u32 %v285_v9, %v261_v15 }
  0x15   : > { %306 = vmatprep.subr.bf16.mxu0 %v290_v16 }
  0x16   : > { %412 = vperm.xlu0 %2307, %v238_v11   ;;  %307 = vmatpush1.bf16.msra.mxu0 %v287_v18 }
  0x17   : > { %417 = vperm.xlu1 %2308, %v239_v14  }
  0x19   : > { %2243 = vmatmul.mubr.msk.bf16.vlgmr.msra.gmra.mxu0 %vm278_vm2, %v2309_v17 }
  0x1a   : > { %520 = vmatprep.mubr.bf16.mxu0 %v3550_v0 }
  0x89   : > { %v266_v19 = vpop.permute.xlu0 %265  ;;  %v399_v16 = vpop.permute.xlu1 %398 }
  0x8d   : > { %v271_v24 = vpop.permute.xlu0 %270  ;;  %v404_v17 = vpop.permute.xlu1 %403 }
  0xd9   : > { %v326_v20 = vpop.f32.mrf.mxu0 }
  0xda   : > { %v327_v21 = vadd.f32 %v326_v20, %v266_v19 }
  0xdb   : > { %v328_v22 = vpop.f32.mrf.mxu0 }
  0xdc   : > { %v329_v23 = vadd.f32 %v328_v22, %v266_v19  ;;  %v339_v26 = vmul.f32 0.2, %v327_v21  ;;  %vm335_vm3 = vcmp.gt.f32.partialorder %v327_v21, 0.0 }
  0xdd   : > { %v330_v25 = vpop.f32.mrf.mxu0 }
  0xde   : > { %v331_v27 = vadd.f32 %v330_v25, %v271_v24  ;;  %v340_v29 = vmul.f32 0.2, %v329_v23  ;;  %vm336_vm5 = vcmp.gt.f32.partialorder %v329_v23, 0.0  ;;  %v2635_v32 = vsel %vm335_vm3, %v327_v21, %v339_v26  ;;  %v413_v26 = vpop.permute.xlu0 %412 }
  0xdf   : > { %v332_v28 = vpop.f32.mrf.mxu0  ;;  %3580 = vst [vmem:[#allocation2_spill] sm:$0xff] %v2635_v32 }
  0xe0   : > { %vm337_vm4 = vcmp.gt.f32.partialorder %v331_v27, 0.0  ;;  %v341_v30 = vmul.f32 0.2, %v331_v27  ;;  %v333_v31 = vadd.f32 %v332_v28, %v271_v24  ;;  %v2641_v36 = vsel %vm336_vm5, %v329_v23, %v340_v29  ;;  %v418_v29 = vpop.permute.xlu1 %417 }
  0xe1   : > { %3582 = vst [vmem:[#allocation4_spill] sm:$0xff] %v2641_v36 }
  0xe2   : > { %v2637_v33 = vsel %vm337_vm4, %v331_v27, %v341_v30  ;;  %vm338_vm6 = vcmp.gt.f32.partialorder %v333_v31, 0.0  ;;  %v342_v34 = vmul.f32 0.2, %v333_v31 }
  0xe3   : > { %3581 = vst [vmem:[#allocation3_spill] sm:$0xff] %v2637_v33  ;;  %v347_v35 = vadd.f32 %v2637_v33, %v2635_v32 }
  0xe4   : > { %v2643_v37 = vsel %vm338_vm6, %v333_v31, %v342_v34 }
  0xe5   : > { %3583 = vst [vmem:[#allocation5_spill] sm:$0xff] %v2643_v37  ;;  %v348_v38 = vrot.slane %v347_v35, 4  ;;  %v354_v39 = vadd.f32 %v2643_v37, %v2641_v36 }
  0xe7   : > { %v349_v40 = vadd.f32 %v348_v38, %v347_v35  ;;  %v355_v41 = vrot.slane %v354_v39, 4 }
  0xe9   : > { %v350_v42 = vrot.slane %v349_v40, 2  ;;  %v356_v43 = vadd.f32 %v355_v41, %v354_v39  ;;  %v2311_v41 = vld [vmem:[%s3546_s1 + $0x10] sm:$0xff]  }
  0xeb   : > { %v351_v44 = vadd.f32 %v350_v42, %v349_v40  ;;  %v357_v45 = vrot.slane %v356_v43, 2  ;;  %v2310_v40 = vld [vmem:[%s3546_s1 + $0x8] sm:$0xff]  }
  0xed   : > { %v352_v46 = vrot.slane %v351_v44, 1  ;;  %v358_v47 = vadd.f32 %v357_v45, %v356_v43 }
  0xef   : > { %v353_v48 = vadd.f32 %v352_v46, %v351_v44  ;;  %v359_v49 = vrot.slane %v358_v47, 1 }
  0xf1   : > { %v362_v50 = vmul.f32 0.0625, %v353_v48  ;;  %v360_v51 = vadd.f32 %v359_v49, %v358_v47 }
  0xf3   : > { %v366_v52 = vsub.f32 %v2637_v33, %v362_v50  ;;  %v363_v53 = vmul.f32 0.0625, %v360_v51  ;;  %v364_v54 = vsub.f32 %v2635_v32, %v362_v50 }
  0xf5   : > { %v370_v55 = vmul.f32 %v366_v52, %v366_v52  ;;  %v367_v56 = vsub.f32 %v2643_v37, %v363_v53  ;;  %v365_v57 = vsub.f32 %v2641_v36, %v363_v53  ;;  %v368_v58 = vmul.f32 %v364_v54, %v364_v54 }
  0xf7   : > { %v371_v59 = vmul.f32 %v367_v56, %v367_v56  ;;  %v369_v60 = vmul.f32 %v365_v57, %v365_v57  ;;  %v372_v61 = vadd.f32 %v370_v55, %v368_v58 }
  0xf9   : > { %v373_v62 = vrot.slane %v372_v61, 4  ;;  %v379_v63 = vadd.f32 %v371_v59, %v369_v60 }
  0xfb   : > { %v374_v1 = vadd.f32 %v373_v62, %v372_v61  ;;  %v380_v2 = vrot.slane %v379_v63, 4 }
  0xfd   : > { %v375_v3 = vrot.slane %v374_v1, 2  ;;  %v381_v4 = vadd.f32 %v380_v2, %v379_v63 }
  0xff   : > { %v376_v5 = vadd.f32 %v375_v3, %v374_v1  ;;  %v382_v6 = vrot.slane %v381_v4, 2 }
 0x101   : > { %v377_v7 = vrot.slane %v376_v5, 1  ;;  %v383_v8 = vadd.f32 %v382_v6, %v381_v4 }
 0x103   : > { %v378_v9 = vadd.f32 %v377_v7, %v376_v5  ;;  %v384_v10 = vrot.slane %v383_v8, 1 }
 0x105   : > { %v385_v11 = vadd.f32 %v384_v10, %v383_v8  ;;  %v386_v12 = vmul.f32 0.0625, %v378_v9 }
 0x107   : > { %v387_v13 = vmul.f32 0.0625, %v385_v11  ;;  %v388_v14 = vadd.f32 1e-05, %v386_v12 }
 0x109   : > { %v389_v15 = vadd.f32 1e-05, %v387_v13  ;;  %2320 = vrsqrt.f32 %v388_v14 }
 0x10b   : > { %2322 = vrsqrt.f32 %v389_v15 }
 0x116   : > { %v2321_v18 = vpop.eup %2320 }
 0x117   : > { %v392_v19 = vmul.f32 %v2321_v18, %v364_v54  ;;  %v394_v20 = vmul.f32 %v2321_v18, %v366_v52 }
 0x118   : > { %v2323_v21 = vpop.eup %2322 }
 0x119   : > { %v393_v22 = vmul.f32 %v2323_v21, %v365_v57  ;;  %v406_v23 = vmul.f32 %v399_v16, %v392_v19  ;;  %v395_v24 = vmul.f32 %v2323_v21, %v367_v56  ;;  %v408_v25 = vmul.f32 %v404_v17, %v394_v20 }
 0x11b   : > { %v407_v27 = vmul.f32 %v399_v16, %v393_v22  ;;  %v409_v28 = vmul.f32 %v404_v17, %v395_v24  ;;  %v420_v30 = vadd.f32 %v413_v26, %v406_v23  ;;  %v422_v31 = vadd.f32 %v418_v29, %v408_v25 }
 0x11d   : > { %v421_v34 = vadd.f32 %v413_v26, %v407_v27  ;;  %v423_v35 = vadd.f32 %v418_v29, %v409_v28  ;;  %v424_v39 = vpack.c.bf16 %v422_v31, %v420_v30 }
 0x11f   : > { %v425_v38 = vpack.c.bf16 %v423_v35, %v421_v34 }
 0x121   : > { %449 = vmatprep.subr.bf16.mxu1 %v425_v38  ;;  %502 = vmatprep.subr.bf16.mxu0 %v425_v38 }
 0x122   : > { %450 = vmatpush1.bf16.msra.mxu1 %v424_v39  ;;  %503 = vmatpush1.bf16.msra.mxu0 %v424_v39 }
 0x123   : > { %555 = vmatprep.subr.bf16.mxu1 %v425_v38 }
 0x125   : > { %2245 = vmatmul.mubr.msk.bf16.vlgmr.msra.gmra.mxu1 %vm431_vm7, %v2310_v40  ;;  %2247 = vmatmul.mubr.msk.bf16.vlgmr.msra.gmra.mxu0 %vm431_vm7, %v2311_v41 }
 0x126   : > { %556 = vmatpush1.bf16.msra.mxu1 %v424_v39  ;;  %698 = vmatprep.mubr.bf16.mxu0 %v3550_v0 }
 0x127   : > { %573 = vmatprep.mubr.bf16.mxu1 %v3550_v0 }
 0x1e5   : > { %v469_v42 = vpop.f32.mrf.mxu1  ;;  %v522_v43 = vpop.f32.mrf.mxu0 }
 0x1e7   : > { %v471_v44 = vpop.f32.mrf.mxu1  ;;  %v524_v45 = vpop.f32.mrf.mxu0 }
 0x1e9   : > { %v473_v46 = vpop.f32.mrf.mxu1  ;;  %v526_v47 = vpop.f32.mrf.mxu0 }
 0x1ea   : > { %v478_v48 = vpack.c.bf16 %v473_v46, %v469_v42  ;;  %v531_v50 = vpack.c.bf16 %v526_v47, %v522_v43 }
 0x1eb   : > { %v475_v49 = vpop.f32.mrf.mxu1  ;;  %v528_v51 = vpop.f32.mrf.mxu0 }
 0x1ec   : > { %v479_v52 = vpack.c.bf16 %v475_v49, %v471_v44  ;;  %586 = vxpose.xlu0.c.b16.start.end [1/1] (short) %v478_v48, 128  ;;  %v532_v53 = vpack.c.bf16 %v528_v51, %v524_v45 }
 0x1ee   : > { %602 = vxpose.xlu1.c.b16.start.end [1/1] (short) %v479_v52, 128  ;;  %680 = vmatprep.subr.bf16.mxu0 %v532_v53 }
 0x1ef   : > { %681 = vmatpush1.bf16.msra.mxu0 %v531_v50 }
 0x24e   : > { %v594_v54 = vpop.trf.xlu0 }
 0x24f   : > { %2250 = vmatmul.mubr.msk.bf16.vlgmr.msra.gmra.mxu0 %vm431_vm7, %v594_v54 }
 0x250   : > { %708 = vmatprep.mubr.bf16.mxu0 %v3550_v0  ;;  %v610_v62 = vpop.trf.xlu1 }
 0x252   : > { %v595_v55 = vpop.trf.xlu0 }
 0x254   : > { %v611_v63 = vpop.trf.xlu1 }
 0x256   : > { %v596_v56 = vpop.trf.xlu0 }
 0x257   : > { %2251 = vmatmul.mubr.msk.bf16.gmra.mxu0 %vm431_vm7, %v595_v55 }
 0x258   : > { %718 = vmatprep.mubr.bf16.mxu0 %v3550_v0  ;;  %v612_v1 = vpop.trf.xlu1 }
 0x25a   : > { %v597_v57 = vpop.trf.xlu0 }
 0x25c   : > { %v613_v2 = vpop.trf.xlu1 }
 0x25e   : > { %v598_v58 = vpop.trf.xlu0 }
 0x25f   : > { %2252 = vmatmul.mubr.msk.bf16.gmra.mxu0 %vm431_vm7, %v596_v56 }
 0x260   : > { %728 = vmatprep.mubr.bf16.mxu0 %v3550_v0  ;;  %v614_v3 = vpop.trf.xlu1 }
 0x262   : > { %v599_v59 = vpop.trf.xlu0 }
 0x264   : > { %v615_v4 = vpop.trf.xlu1 }
 0x266   : > { %v600_v60 = vpop.trf.xlu0 }
 0x267   : > { %2253 = vmatmul.mubr.msk.bf16.gmra.mxu0 %vm431_vm7, %v597_v57 }
 0x268   : > { %738 = vmatprep.mubr.bf16.mxu0 %v3550_v0  ;;  %v616_v5 = vpop.trf.xlu1 }
 0x26a   : > { %v601_v61 = vpop.trf.xlu0 }
 0x26c   : > { %v617_v6 = vpop.trf.xlu1 }
 0x26f   : > { %2254 = vmatmul.mubr.msk.bf16.gmra.mxu0 %vm431_vm7, %v598_v58 }
 0x270   : > { %748 = vmatprep.mubr.bf16.mxu0 %v3550_v0 }
 0x277   : > { %2255 = vmatmul.mubr.msk.bf16.gmra.mxu0 %vm431_vm7, %v599_v59 }
 0x278   : > { %758 = vmatprep.mubr.bf16.mxu0 %v3550_v0 }
 0x27f   : > { %2256 = vmatmul.mubr.msk.bf16.gmra.mxu0 %vm431_vm7, %v600_v60 }
 0x280   : > { %768 = vmatprep.mubr.bf16.mxu0 %v3550_v0 }
 0x287   : > { %2257 = vmatmul.mubr.msk.bf16.gmra.mxu0 %vm431_vm7, %v601_v61 }
 0x288   : > { %778 = vmatprep.mubr.bf16.mxu0 %v3550_v0 }
 0x28f   : > { %2258 = vmatmul.mubr.msk.bf16.gmra.mxu0 %vm431_vm7, %v610_v62 }
 0x290   : > { %788 = vmatprep.mubr.bf16.mxu0 %v3550_v0 }
 0x297   : > { %2259 = vmatmul.mubr.msk.bf16.gmra.mxu0 %vm431_vm7, %v611_v63 }
 0x298   : > { %798 = vmatprep.mubr.bf16.mxu0 %v3550_v0 }
 0x29f   : > { %2260 = vmatmul.mubr.msk.bf16.gmra.mxu0 %vm431_vm7, %v612_v1 }
 0x2a0   : > { %808 = vmatprep.mubr.bf16.mxu0 %v3550_v0 }
 0x2a7   : > { %2261 = vmatmul.mubr.msk.bf16.gmra.mxu0 %vm431_vm7, %v613_v2 }
 0x2a8   : > { %818 = vmatprep.mubr.bf16.mxu0 %v3550_v0 }
 0x2af   : > { %2262 = vmatmul.mubr.msk.bf16.gmra.mxu0 %vm431_vm7, %v614_v3 }
 0x2b0   : > { %828 = vmatprep.mubr.bf16.mxu0 %v3550_v0 }
 0x2b7   : > { %2263 = vmatmul.mubr.msk.bf16.gmra.mxu0 %vm431_vm7, %v615_v4 }
 0x2b8   : > { %838 = vmatprep.mubr.bf16.mxu0 %v3550_v0 }
 0x2bf   : > { %2264 = vmatmul.mubr.msk.bf16.gmra.mxu0 %vm431_vm7, %v616_v5 }
 0x2c0   : > { %848 = vmatprep.mubr.bf16.mxu0 %v3550_v0 }
 0x2c7   : > { %2265 = vmatmul.mubr.msk.bf16.gmra.mxu0 %vm431_vm7, %v617_v6 }
 0x2c8   : > { %1520 = vmatprep.mubr.bf16.mxu0 %v3550_v0 }
 0x30f   : > { %v2693_v7 = vpop.f32.mrf.mxu0 }
 0x311   : > { %v2695_v8 = vpop.f32.mrf.mxu0 }
 0x313   : > { %v2697_v9 = vpop.f32.mrf.mxu0 }
 0x315   : > { %v2699_v10 = vpop.f32.mrf.mxu0 }
 0x317   : > { %v2701_v11 = vpop.f32.mrf.mxu0 }
 0x319   : > { %v2703_v12 = vpop.f32.mrf.mxu0 }
 0x31b   : > { %v2705_v13 = vpop.f32.mrf.mxu0 }
 0x31d   : > { %v2707_v14 = vpop.f32.mrf.mxu0 }
 0x31f   : > { %v2709_v15 = vpop.f32.mrf.mxu0 }
 0x321   : > { %v722_v16 = vpop.f32.mrf.mxu0 }
 0x323   : > { %v2711_v17 = vpop.f32.mrf.mxu0 }
 0x325   : > { %v2713_v18 = vpop.f32.mrf.mxu0 }
 0x327   : > { %v730_v19 = vpop.f32.mrf.mxu0 }
 0x329   : > { %v732_v20 = vpop.f32.mrf.mxu0 }
 0x32a   : > { %v2763_v4 = vmul.f32 0.25, %v732_v20  ;;  %v2779_v20 = vmul.f32 0.25, %v722_v16  ;;  %v2797_v16 = vmul.f32 0.25, %v2703_v12 }
 0x32b   : > { %v734_v21 = vpop.f32.mrf.mxu0 }
 0x32d   : > { %v736_v22 = vpop.f32.mrf.mxu0 }
 0x32f   : > { %v740_v23 = vpop.f32.mrf.mxu0 }
 0x330   : > { %v2757_v1 = vmul.f32 0.25, %v740_v23  ;;  %v2773_v23 = vmul.f32 0.25, %v730_v19  ;;  %v2790_v19 = vmul.f32 0.25, %v2709_v15 }
 0x331   : > { %v742_v24 = vpop.f32.mrf.mxu0 }
 0x332   : > { %v2747_v59 = vmul.f32 0.25, %v742_v24 }
 0x333   : > { %v744_v25 = vpop.f32.mrf.mxu0 }
 0x334   : > { %v947_v24 = vmax.f32 %v2757_v1, %v2747_v59 }
 0x335   : > { %v746_v26 = vpop.f32.mrf.mxu0 }
 0x336   : > { %v2765_v5 = vmul.f32 0.25, %v746_v26  ;;  %v2781_v26 = vmul.f32 0.25, %v736_v22  ;;  %v2800_v22 = vmul.f32 0.25, %v2713_v18  ;;  %v2817_v18 = vmul.f32 0.25, %v2695_v8 }
 0x337   : > { %v750_v27 = vpop.f32.mrf.mxu0 }
 0x338   : > { %v2741_v56 = vmul.f32 0.25, %v750_v27 }
 0x339   : > { %v752_v28 = vpop.f32.mrf.mxu0 }
 0x33a   : > { %v2731_v51 = vmul.f32 0.25, %v752_v28  ;;  %v2775_v28 = vmul.f32 0.25, %v744_v25  ;;  %v2792_v25 = vmul.f32 0.25, %v734_v21  ;;  %v2809_v21 = vmul.f32 0.25, %v2701_v11 }
 0x33b   : > { %v754_v29 = vpop.f32.mrf.mxu0 }
 0x33c   : > { %v953_v62 = vmax.f32 %v2741_v56, %v2731_v51  ;;  %v2759_v2 = vmul.f32 0.25, %v754_v29  ;;  %v929_v11 = vmax.f32 %v2809_v21, %v2797_v16 }
 0x33d   : > { %v756_v30 = vpop.f32.mrf.mxu0 }
 0x33e   : > { %v2749_v60 = vmul.f32 0.25, %v756_v30  ;;  %v950_v30 = vmax.f32 %v2775_v28, %v2765_v5 }
 0x33f   : > { %v760_v31 = vpop.f32.mrf.mxu0 }
 0x340   : > { %v2723_v47 = vmul.f32 0.25, %v760_v31  ;;  %v956_v6 = vmax.f32 %v2759_v2, %v2749_v60  ;;  %v941_v31 = vmax.f32 %v2773_v23, %v2763_v4 }
 0x341   : > { %v762_v34 = vpop.f32.mrf.mxu0 }
 0x342   : > { %v2719_v44 = vmul.f32 0.25, %v762_v34 }
 0x343   : > { %v764_v35 = vpop.f32.mrf.mxu0 }
 0x344   : > { %v959_v53 = vmax.f32 %v2723_v47, %v2719_v44  ;;  %v2743_v57 = vmul.f32 0.25, %v764_v35 }
 0x345   : > { %v766_v38 = vpop.f32.mrf.mxu0 }
 0x346   : > { %v2733_v52 = vmul.f32 0.25, %v766_v38  ;;  %v944_v38 = vmax.f32 %v2792_v25, %v2781_v26 }
 0x347   : > { %v770_v39 = vpop.f32.mrf.mxu0 }
 0x348   : > { %v2715_v41 = vmul.f32 0.25, %v770_v39  ;;  %v962_v61 = vmax.f32 %v2743_v57, %v2733_v52  ;;  %v935_v39 = vmax.f32 %v2790_v19, %v2779_v20 }
 0x349   : > { %v772_v40 = vpop.f32.mrf.mxu0 }
 0x34a   : > { %v2717_v42 = vmul.f32 0.25, %v772_v40  ;;  %v2812_v40 = vmul.f32 0.25, %v2711_v17  ;;  %v2829_v17 = vmul.f32 0.25, %v2693_v7  ;;  %v2846_v7 = vmul.f32 0.25, %v2697_v9 }
 0x34b   : > { %v774_v43 = vpop.f32.mrf.mxu0 }
 0x34c   : > { %v965_v45 = vmax.f32 %v2715_v41, %v2717_v42  ;;  %v2725_v48 = vmul.f32 0.25, %v774_v43  ;;  %v2820_v43 = vmul.f32 0.25, %v2707_v14  ;;  %v2837_v14 = vmul.f32 0.25, %v2699_v10  ;;  %3592 = vst [vmem:[#allocation14_spill] sm:$0xff] %v2846_v7 }
 0x34d   : > { %v776_v46 = vpop.f32.mrf.mxu0 }
 0x34e   : > { %v2727_v49 = vmul.f32 0.25, %v776_v46  ;;  %966 = vmax.xlane.f32.xlu0 %v965_v45  ;;  %3589 = vst [vmem:[#allocation11_spill] sm:$0xff] %v2820_v43  ;;  %v938_v45 = vmax.f32 %v2812_v40, %v2800_v22  ;;  %3591 = vst [vmem:[#allocation13_spill] sm:$0xff] %v2837_v14 }
 0x34f   : > { %v2729_v50 = vpop.f32.mrf.mxu0 }
 0x350   : > { %3584 = vst [vmem:[#allocation6_spill] sm:$0xff] %v2729_v50  ;;  %v968_v54 = vmax.f32 %v2725_v48, %v2727_v49 }
 0x351   : > { %v2739_v55 = vpop.f32.mrf.mxu0 }
 0x352   : > { %3585 = vst [vmem:[#allocation7_spill] sm:$0xff] %v2739_v55  ;;  %960 = vmax.xlane.f32.xlu0 %v959_v53  ;;  %969 = vmax.xlane.f32.xlu1 %v968_v54  ;;  %v2832_v53 = vmul.f32 0.25, %v2705_v13 }
 0x353   : > { %v2745_v58 = vpop.f32.mrf.mxu0 }
 0x354   : > { %3586 = vst [vmem:[#allocation8_spill] sm:$0xff] %v2745_v58  ;;  %3590 = vst [vmem:[#allocation12_spill] sm:$0xff] %v2832_v53  ;;  %v932_v54 = vmax.f32 %v2832_v53, %v2820_v43 }
 0x355   : > { %v2755_v63 = vpop.f32.mrf.mxu0 }
 0x356   : > { %3587 = vst [vmem:[#allocation9_spill] sm:$0xff] %v2755_v63  ;;  %963 = vmax.xlane.f32.xlu0 %v962_v61  ;;  %954 = vmax.xlane.f32.xlu1 %v953_v62  ;;  %v923_v61 = vmax.f32 %v2829_v17, %v2817_v18 }
 0x357   : > { %v2761_v3 = vpop.f32.mrf.mxu0 }
 0x359   : > { %v2771_v27 = vpop.f32.mrf.mxu0 }
 0x35a   : > { %957 = vmax.xlane.f32.xlu0 %v956_v6  ;;  %948 = vmax.xlane.f32.xlu1 %v947_v24  ;;  %v926_v6 = vmax.f32 %v2846_v7, %v2837_v14 }
 0x35b   : > { %v2777_v29 = vpop.f32.mrf.mxu0 }
 0x35d   : > { %v2787_v34 = vpop.f32.mrf.mxu0 }
 0x35e   : > { %3588 = vst [vmem:[#allocation10_spill] sm:$0xff] %v2787_v34  ;;  %951 = vmax.xlane.f32.xlu0 %v950_v30  ;;  %942 = vmax.xlane.f32.xlu1 %v941_v31 }
 0x35f   : > { %v2794_v35 = vpop.f32.mrf.mxu0 }
 0x361   : > { %v2806_v15 = vpop.f32.mrf.mxu0 }
 0x362   : > { %945 = vmax.xlane.f32.xlu0 %v944_v38  ;;  %936 = vmax.xlane.f32.xlu1 %v935_v39 }
 0x363   : > { %v2814_v12 = vpop.f32.mrf.mxu0 }
 0x365   : > { %v2826_v46 = vpop.f32.mrf.mxu0 }
 0x366   : > { %939 = vmax.xlane.f32.xlu0 %v938_v45  ;;  %930 = vmax.xlane.f32.xlu1 %v929_v11 }
 0x367   : > { %v2834_v8 = vpop.f32.mrf.mxu0 }
 0x369   : > { %v2843_v62 = vpop.f32.mrf.mxu0 }
 0x36a   : > { %933 = vmax.xlane.f32.xlu0 %v932_v54  ;;  %924 = vmax.xlane.f32.xlu1 %v923_v61 }
 0x36b   : > { %v2848_v13 = vpop.f32.mrf.mxu0 }
 0x36d   : > { %v2852_v10 = vpop.f32.mrf.mxu0 }
 0x36e   : > { %927 = vmax.xlane.f32.xlu0 %v926_v6 }
 0x36f   : > { %v820_v24 = vpop.f32.mrf.mxu0 }
 0x371   : > { %v822_v30 = vpop.f32.mrf.mxu0 }
 0x373   : > { %v824_v31 = vpop.f32.mrf.mxu0 }
 0x375   : > { %v826_v38 = vpop.f32.mrf.mxu0 }
 0x377   : > { %v830_v39 = vpop.f32.mrf.mxu0 }
 0x378   : > { %v2866_v50 = vmul.f32 0.25, %v830_v39  ;;  %v2882_v39 = vmul.f32 0.25, %v822_v30 }
 0x379   : > { %v832_v45 = vpop.f32.mrf.mxu0 }
 0x37a   : > { %v2868_v43 = vmul.f32 0.25, %v832_v45  ;;  %3595 = vst [vmem:[#allocation17_spill] sm:$0xff] %v2882_v39 }
 0x37b   : > { %v834_v11 = vpop.f32.mrf.mxu0 }
 0x37c   : > { %v2884_v45 = vmul.f32 0.25, %v834_v11 }
 0x37d   : > { %v836_v0 = vpop.f32.mrf.mxu0 }
 0x37f   : > { %v840_v9 = vpop.f32.mrf.mxu0 }
 0x380   : > { %v2856_v63 = vmul.f32 0.25, %v840_v9 }
 0x381   : > { %v842_v37 = vpop.f32.mrf.mxu0 }
 0x382   : > { %v2858_v58 = vmul.f32 0.25, %v842_v37 }
 0x383   : > { %v844_v54 = vpop.f32.mrf.mxu0 }
 0x385   : > { %v846_v61 = vpop.f32.mrf.mxu0 }
 0x386   : > { %v2872_v34 = vmul.f32 0.25, %v846_v61  ;;  %v2894_v61 = vmul.f32 0.25, %v826_v38 }
 0x387   : > { %v850_v36 = vpop.f32.mrf.mxu0 }
 0x388   : > { %v2854_v33 = vmul.f32 0.25, %v850_v36  ;;  %v2870_v36 = vmul.f32 0.25, %v844_v54  ;;  %v2892_v54 = vmul.f32 0.25, %v824_v31  ;;  %3598 = vst [vmem:[#allocation20_spill] sm:$0xff] %v2894_v61 }
 0x389   : > { %v852_v32 = vpop.f32.mrf.mxu0 }
 0x38a   : > { %v2860_v6 = vmul.f32 0.25, %v852_v32  ;;  %v1007_v32 = vmax.f32 %v2856_v63, %v2858_v58  ;;  %3597 = vst [vmem:[#allocation19_spill] sm:$0xff] %v2892_v54  ;;  %v998_v30 = vmax.f32 %v2892_v54, %v2894_v61 }
 0x38b   : > { %v854_v14 = vpop.f32.mrf.mxu0 }
 0x38c   : > { %3593 = vst [vmem:[#allocation15_spill] sm:$0xff] %v2860_v6  ;;  %v2862_v7 = vmul.f32 0.25, %v854_v14  ;;  %v1013_v55 = vmax.f32 %v2854_v33, %v2860_v6  ;;  %v2880_v14 = vmul.f32 0.25, %v820_v24  ;;  %v2886_v6 = vmul.f32 0.25, %v836_v0 }
 0x38d   : > { %v856_v53 = vpop.f32.mrf.mxu0 }
 0x38e   : > { %v2874_v9 = vmul.f32 0.25, %v856_v53  ;;  %1014 = vmax.xlane.f32.xlu1 %v1013_v55  ;;  %3594 = vst [vmem:[#allocation16_spill] sm:$0xff] %v2880_v14  ;;  %3596 = vst [vmem:[#allocation18_spill] sm:$0xff] %v2886_v6  ;;  %v1001_v53 = vmax.f32 %v2866_v50, %v2868_v43  ;;  %v1010_v55 = vmax.f32 %v2870_v36, %v2872_v34 }
 0x38f   : > { %v995_v24 = vmax.f32 %v2880_v14, %v2882_v39  ;;  %v1004_v0 = vmax.f32 %v2884_v45, %v2886_v6 }
 0x390   : > { %v1016_v37 = vmax.f32 %v2862_v7, %v2874_v9 }
 0x392   : > { %1008 = vmax.xlane.f32.xlu1 %v1007_v32  ;;  %1017 = vmax.xlane.f32.xlu0 %v1016_v37 }
 0x396   : > { %1002 = vmax.xlane.f32.xlu1 %v1001_v53  ;;  %1011 = vmax.xlane.f32.xlu0 %v1010_v55 }
 0x39a   : > { %996 = vmax.xlane.f32.xlu1 %v995_v24  ;;  %1005 = vmax.xlane.f32.xlu0 %v1004_v0 }
 0x39e   : > { %999 = vmax.xlane.f32.xlu0 %v998_v30 }
 0x3d7   : > { %v967_v11 = vpop.xlane.xlu0 %966 }
 0x3d8   : > { %v1047_v31 = vsub.f32 %v2715_v41, %v967_v11  ;;  %v1048_v38 = vsub.f32 %v2717_v42, %v967_v11 }
 0x3da   : > { %v1139_v32 = vmul.f32 1.442695, %v1047_v31  ;;  %v1141_v37 = vmul.f32 1.442695, %v1048_v38 }
 0x3db   : > { %v961_v53 = vpop.xlane.xlu0 %960  ;;  %v970_v55 = vpop.xlane.xlu1 %969 }
 0x3dc   : > { %2324 = vpow2.f32 %v1139_v32  ;;  %v1043_v39 = vsub.f32 %v2723_v47, %v961_v53  ;;  %v1044_v14 = vsub.f32 %v2719_v44, %v961_v53  ;;  %v1049_v24 = vsub.f32 %v2725_v48, %v970_v55 }
 0x3dd   : > { %2326 = vpow2.f32 %v1141_v37  ;;  %v1050_v0 = vsub.f32 %v2727_v49, %v970_v55 }
 0x3de   : > { %v1131_v30 = vmul.f32 1.442695, %v1043_v39  ;;  %v1133_v61 = vmul.f32 1.442695, %v1044_v14  ;;  %v1143_v54 = vmul.f32 1.442695, %v1049_v24 }
 0x3df   : > { %v1145_v41 = vmul.f32 1.442695, %v1050_v0  ;;  %v964_v6 = vpop.xlane.xlu0 %963  ;;  %v955_v42 = vpop.xlane.xlu1 %954 }
 0x3e0   : > { %2328 = vpow2.f32 %v1131_v30  ;;  %v1045_v11 = vsub.f32 %v2743_v57, %v964_v6  ;;  %v1046_v31 = vsub.f32 %v2733_v52, %v964_v6  ;;  %v1039_v44 = vsub.f32 %v2741_v56, %v955_v42 }
 0x3e1   : > { %2330 = vpow2.f32 %v1133_v61  ;;  %v1040_v47 = vsub.f32 %v2731_v51, %v955_v42  ;;  %v2919_v51 = vmul.f32 0.25, %v2834_v8  ;;  %v2923_v61 = vmul.f32 0.25, %v2843_v62 }
 0x3e2   : > { %2332 = vpow2.f32 %v1143_v54  ;;  %v1135_v39 = vmul.f32 1.442695, %v1045_v11  ;;  %v1137_v14 = vmul.f32 1.442695, %v1046_v31  ;;  %v1123_v38 = vmul.f32 1.442695, %v1039_v44 }
 0x3e3   : > { %2334 = vpow2.f32 %v1145_v41  ;;  %v958_v48 = vpop.xlane.xlu0 %957  ;;  %v949_v49 = vpop.xlane.xlu1 %948  ;;  %v1125_v32 = vmul.f32 1.442695, %v1040_v47  ;;  %v989_v11 = vmax.f32 %v2919_v51, %v2923_v61  ;;  %v2939_v31 = vmul.f32 0.25, %v2848_v13 }
 0x3e4   : > { %2336 = vpow2.f32 %v1135_v39  ;;  %v1041_v37 = vsub.f32 %v2759_v2, %v958_v48  ;;  %v1042_v52 = vsub.f32 %v2749_v60, %v958_v48  ;;  %v1035_v54 = vsub.f32 %v2757_v1, %v949_v49 }
 0x3e5   : > { %2338 = vpow2.f32 %v1137_v14  ;;  %v1036_v2 = vsub.f32 %v2747_v59, %v949_v49  ;;  %v2943_v47 = vmul.f32 0.25, %v2852_v10  ;;  %v2949_v39 = vmul.f32 0.25, %v2794_v35 }
 0x3e6   : > { %2340 = vpow2.f32 %v1123_v38  ;;  %v1127_v60 = vmul.f32 1.442695, %v1041_v37  ;;  %v1129_v0 = vmul.f32 1.442695, %v1042_v52  ;;  %v1115_v8 = vmul.f32 1.442695, %v1035_v54 }
 0x3e7   : > { %v952_v57 = vpop.xlane.xlu0 %951  ;;  %v943_v6 = vpop.xlane.xlu1 %942  ;;  %2342 = vpow2.f32 %v1125_v32  ;;  %v1117_v1 = vmul.f32 1.442695, %v1036_v2  ;;  %v2953_v14 = vmul.f32 0.25, %v2806_v15 }
 0x3e8   : > { %2344 = vpow2.f32 %v1127_v60  ;;  %v1037_v44 = vsub.f32 %v2775_v28, %v952_v57  ;;  %v1038_v48 = vsub.f32 %v2765_v5, %v952_v57  ;;  %v1031_v13 = vsub.f32 %v2773_v23, %v943_v6 }
 0x3e9   : > { %v2913_v53 = vpop.eup %2324  ;;  %2346 = vpow2.f32 %v1129_v0  ;;  %v1032_v28 = vsub.f32 %v2763_v4, %v943_v6  ;;  %v992_v23 = vmax.f32 %v2939_v31, %v2943_v47  ;;  %v983_v2 = vmax.f32 %v2949_v39, %v2953_v14 }
 0x3ea   : > { %v2916_v56 = vpop.eup %2326  ;;  %2348 = vpow2.f32 %v1115_v8  ;;  %v1119_v10 = vmul.f32 1.442695, %v1037_v44  ;;  %v1121_v32 = vmul.f32 1.442695, %v1038_v48  ;;  %v1107_v15 = vmul.f32 1.442695, %v1031_v13 }
 0x3eb   : > { %v1253_v55 = vadd.f32 %v2916_v56, %v2913_v53  ;;  %v946_v42 = vpop.xlane.xlu0 %945  ;;  %v937_v62 = vpop.xlane.xlu1 %936  ;;  %2350 = vpow2.f32 %v1117_v1  ;;  %v1109_v6 = vmul.f32 1.442695, %v1032_v28  ;;  %v2973_v60 = vmul.f32 0.25, %v2761_v3 }
 0x3ec   : > { %v1027_v57 = vsub.f32 %v2790_v19, %v937_v62  ;;  %v1028_v54 = vsub.f32 %v2779_v20, %v937_v62  ;;  %v2976_v0 = vmul.f32 0.25, %v2814_v12  ;;  %2352 = vpow2.f32 %v1119_v10 }
 0x3ed   : > { %v2928_v24 = vpop.eup %2328  ;;  %1254 = vadd.xlane.f32.xlu1 %v1253_v55  ;;  %v1033_v19 = vsub.f32 %v2792_v25, %v946_v42  ;;  %v2980_v8 = vmul.f32 0.25, %v2826_v46  ;;  %2354 = vpow2.f32 %v1121_v32  ;;  %v1034_v20 = vsub.f32 %v2781_v26, %v946_v42 }
 0x3ee   : > { %v2930_v30 = vpop.eup %2330  ;;  %v2986_v62 = vmul.f32 0.25, %v2771_v27  ;;  %2356 = vpow2.f32 %v1107_v15  ;;  %v1099_v3 = vmul.f32 1.442695, %v1027_v57  ;;  %v3600_v57 = vld [vmem:[#allocation12_spill] sm:$0xff] }
 0x3ef   : > { %v2932_v41 = vpop.eup %2332  ;;  %v1247_v5 = vadd.f32 %v2930_v30, %v2928_v24  ;;  %v940_v37 = vpop.xlane.xlu0 %939  ;;  %2358 = vpow2.f32 %v1109_v6  ;;  %v1111_v42 = vmul.f32 1.442695, %v1033_v19  ;;  %v1113_v27 = vmul.f32 1.442695, %v1034_v20 }
 0x3f0   : > { %v2936_v59 = vpop.eup %2334  ;;  %v931_v35 = vpop.xlane.xlu1 %930  ;;  %v1029_v48 = vsub.f32 %v2812_v40, %v940_v37  ;;  %v1030_v13 = vsub.f32 %v2800_v22, %v940_v37  ;;  %2360 = vpow2.f32 %v1099_v3  ;;  %v977_v22 = vmax.f32 %v2973_v60, %v2986_v62 }
 0x3f1   : > { %990 = vmax.xlane.f32.xlu1 %v989_v11  ;;  %v1256_v49 = vadd.f32 %v2936_v59, %v2932_v41  ;;  %v2958_v38 = vpop.eup %2336  ;;  %v1023_v12 = vsub.f32 %v2809_v21, %v931_v35  ;;  %v1101_v11 = vmul.f32 1.442695, %v1028_v54  ;;  %v1024_v25 = vsub.f32 %v2797_v16, %v931_v35 }
 0x3f2   : > { %v2962_v52 = vpop.eup %2338  ;;  %v986_v21 = vmax.f32 %v2976_v0, %v2980_v8  ;;  %v3001_v16 = vmul.f32 0.25, %v2777_v29  ;;  %v1103_v29 = vmul.f32 1.442695, %v1029_v48  ;;  %v1105_v54 = vmul.f32 1.442695, %v1030_v13 }
 0x3f3   : > { %1257 = vadd.xlane.f32.xlu0 %v1256_v49  ;;  %v2965_v4 = vpop.eup %2340  ;;  %v1250_v1 = vadd.f32 %v2962_v52, %v2958_v38  ;;  %v934_v46 = vpop.xlane.xlu0 %933  ;;  %2362 = vpow2.f32 %v1101_v11  ;;  %v1093_v40 = vmul.f32 1.442695, %v1024_v25  ;;  %v3603_v11 = vld [vmem:[#allocation7_spill] sm:$0xff] }
 0x3f4   : > { %v2970_v55 = vpop.eup %2342  ;;  %v925_v44 = vpop.xlane.xlu1 %924  ;;  %2364 = vpow2.f32 %v1111_v42  ;;  %v1025_v6 = vsub.f32 %v3600_v57, %v934_v46  ;;  %v3026_v25 = vmul.f32 0.25, %v3603_v11  ;;  %v3604_v42 = vld [vmem:[#allocation14_spill] sm:$0xff] }
 0x3f5   : > { %1248 = vadd.xlane.f32.xlu1 %v1247_v5  ;;  %v1241_v26 = vadd.f32 %v2970_v55, %v2965_v4  ;;  %v2993_v49 = vpop.eup %2344  ;;  %v1091_v5 = vmul.f32 1.442695, %v1023_v12  ;;  %v1019_v10 = vsub.f32 %v2829_v17, %v925_v44  ;;  %v1020_v35 = vsub.f32 %v2817_v18, %v925_v44  ;;  %v2312_v17 = vld [vmem:[%s3546_s1 + $0x18] sm:$0xff]   ;;  %v3601_v18 = vld [vmem:[#allocation11_spill] sm:$0xff] }
 0x3f6   : > { %v2998_v28 = vpop.eup %2346  ;;  %2366 = vpow2.f32 %v1113_v27  ;;  %2249 = vmatmul.mubr.msk.bf16.vlgmr.msra.gmra.mxu1 %vm431_vm7, %v2312_v17  ;;  %v3607_v17 = vld [vmem:[#allocation9_spill] sm:$0xff] }
 0x3f7   : > { %993 = vmax.xlane.f32.xlu0 %v992_v23  ;;  %v3004_v32 = vpop.eup %2348  ;;  %v3599_v23 = vld [vmem:[#allocation10_spill] sm:$0xff]  ;;  %v928_v19 = vpop.xlane.xlu0 %927  ;;  %v1244_v20 = vadd.f32 %v2998_v28, %v2993_v49  ;;  %2368 = vpow2.f32 %v1091_v5  ;;  %v1083_v12 = vmul.f32 1.442695, %v1019_v10  ;;  %v1085_v44 = vmul.f32 1.442695, %v1020_v35 }
 0x3f8   : > { %v3009_v37 = vpop.eup %2350  ;;  %v3012_v15 = vmul.f32 0.25, %v3599_v23  ;;  %2370 = vpow2.f32 %v1093_v40  ;;  %v1021_v48 = vsub.f32 %v3604_v42, %v928_v19 }
 0x3f9   : > { %984 = vmax.xlane.f32.xlu1 %v983_v2  ;;  %v1026_v2 = vsub.f32 %v3601_v18, %v934_v46  ;;  %v1235_v46 = vadd.f32 %v3009_v37, %v3004_v32  ;;  %2372 = vpow2.f32 %v1103_v29  ;;  %v3031_v27 = vpop.eup %2352  ;;  %v3606_v29 = vld [vmem:[#allocation8_spill] sm:$0xff] }
 0x3fa   : > { %2374 = vpow2.f32 %v1105_v54  ;;  %v980_v10 = vmax.f32 %v3001_v16, %v3012_v15  ;;  %v3036_v40 = vpop.eup %2354  ;;  %v3045_v57 = vmul.f32 0.25, %v3606_v29  ;;  %v3048_v54 = vmul.f32 0.25, %v3607_v17 }
 0x3fb   : > { %1251 = vadd.xlane.f32.xlu0 %v1250_v1  ;;  %v3602_v1 = vld [vmem:[#allocation6_spill] sm:$0xff]  ;;  %v1097_v13 = vmul.f32 1.442695, %v1026_v2  ;;  %2376 = vpow2.f32 %v1083_v12  ;;  %v3038_v35 = vpop.eup %2356  ;;  %v1238_v2 = vadd.f32 %v3036_v40, %v3031_v27 }
 0x3fc   : > { %v3022_v3 = vmul.f32 0.25, %v3602_v1  ;;  %2378 = vpow2.f32 %v1085_v44  ;;  %v3042_v23 = vpop.eup %2358  ;;  %v974_v11 = vmax.f32 %v3045_v57, %v3048_v54 }
 0x3fd   : > { %1242 = vadd.xlane.f32.xlu1 %v1241_v26  ;;  %v1095_v26 = vmul.f32 1.442695, %v1025_v6  ;;  %v1087_v6 = vmul.f32 1.442695, %v1021_v48 }
 0x3ff   : > { %987 = vmax.xlane.f32.xlu0 %v986_v21  ;;  %v3605_v21 = vld [vmem:[#allocation13_spill] sm:$0xff]  ;;  %2380 = vpow2.f32 %v1095_v26 }
 0x400   : > { %v1022_v5 = vsub.f32 %v3605_v21, %v928_v19  ;;  %2382 = vpow2.f32 %v1097_v13  ;;  %v3052_v19 = vpop.eup %2360 }
 0x401   : > { %978 = vmax.xlane.f32.xlu1 %v977_v22  ;;  %v971_v22 = vmax.f32 %v3022_v3, %v3026_v25  ;;  %3608 = vst [vmem:[#allocation10_spill] sm:$0xff] %v3052_v19  ;;  %v3056_v1 = vpop.eup %2362  ;;  %2384 = vpow2.f32 %v1087_v6 }
 0x402   : > { %v1089_v18 = vmul.f32 1.442695, %v1022_v5  ;;  %v3058_v12 = vpop.eup %2364  ;;  %v1223_v26 = vadd.f32 %v3056_v1, %v3052_v19 }
 0x403   : > { %1245 = vadd.xlane.f32.xlu0 %v1244_v20  ;;  %v1229_v20 = vadd.f32 %v3042_v23, %v3038_v35  ;;  %v3062_v44 = vpop.eup %2366 }
 0x404   : > { %2386 = vpow2.f32 %v1089_v18  ;;  %v1232_v13 = vadd.f32 %v3062_v44, %v3058_v12 }
 0x405   : > { %1236 = vadd.xlane.f32.xlu1 %v1235_v46  ;;  %v3064_v46 = vpop.eup %2368 }
 0x406   : > { %3609 = vst [vmem:[#allocation12_spill] sm:$0xff] %v3064_v46  ;;  %v3068_v42 = vpop.eup %2370 }
 0x407   : > { %981 = vmax.xlane.f32.xlu0 %v980_v10  ;;  %3610 = vst [vmem:[#allocation11_spill] sm:$0xff] %v3068_v42  ;;  %v3070_v48 = vpop.eup %2372  ;;  %v1217_v10 = vadd.f32 %v3068_v42, %v3064_v46 }
 0x408   : > { %3611 = vst [vmem:[#allocation6_spill] sm:$0xff] %v3070_v48  ;;  %v3074_v21 = vpop.eup %2374 }
 0x409   : > { %972 = vmax.xlane.f32.xlu1 %v971_v22  ;;  %v3076_v5 = vpop.eup %2376  ;;  %v1226_v6 = vadd.f32 %v3074_v21, %v3070_v48 }
 0x40a   : > { %3612 = vst [vmem:[#allocation7_spill] sm:$0xff] %v3076_v5  ;;  %v3080_v22 = vpop.eup %2378 }
 0x40b   : > { %1239 = vadd.xlane.f32.xlu0 %v1238_v2  ;;  %3613 = vst [vmem:[#allocation14_spill] sm:$0xff] %v3080_v22  ;;  %v1211_v2 = vadd.f32 %v3080_v22, %v3076_v5 }
 0x40c   : > { %v3082_v29 = vpop.eup %2380 }
 0x40d   : > { %1230 = vadd.xlane.f32.xlu1 %v1229_v20  ;;  %3614 = vst [vmem:[#allocation13_spill] sm:$0xff] %v3082_v29  ;;  %v3086_v17 = vpop.eup %2382 }
 0x40e   : > { %3615 = vst [vmem:[#allocation8_spill] sm:$0xff] %v3086_v17  ;;  %v1220_v46 = vadd.f32 %v3086_v17, %v3082_v29 }
 0x40f   : > { %975 = vmax.xlane.f32.xlu0 %v974_v11  ;;  %v3616_v11 = vld [vmem:[#allocation15_spill] sm:$0xff] }
 0x411   : > { %1224 = vadd.xlane.f32.xlu1 %v1223_v26 }
 0x413   : > { %1233 = vadd.xlane.f32.xlu0 %v1232_v13  ;;  %v3092_v13 = vpop.eup %2384 }
 0x414   : > { %v3096_v42 = vpop.eup %2386 }
 0x415   : > { %1218 = vadd.xlane.f32.xlu1 %v1217_v10 }
 0x417   : > { %1227 = vadd.xlane.f32.xlu0 %v1226_v6  ;;  %v1015_v18 = vpop.xlane.xlu1 %1014 }
 0x418   : > { %v1079_v20 = vsub.f32 %v2854_v33, %v1015_v18  ;;  %v1080_v26 = vsub.f32 %v3616_v11, %v1015_v18 }
 0x419   : > { %1212 = vadd.xlane.f32.xlu1 %v1211_v2  ;;  %v1214_v2 = vadd.f32 %v3096_v42, %v3092_v13 }
 0x41a   : > { %v1203_v10 = vmul.f32 1.442695, %v1079_v20  ;;  %v1205_v19 = vmul.f32 1.442695, %v1080_v26 }
 0x41b   : > { %1221 = vadd.xlane.f32.xlu0 %v1220_v46  ;;  %v1018_v6 = vpop.xlane.xlu0 %1017  ;;  %v1009_v48 = vpop.xlane.xlu1 %1008 }
 0x41c   : > { %2388 = vpow2.f32 %v1203_v10  ;;  %v1081_v5 = vsub.f32 %v2862_v7, %v1018_v6  ;;  %v1082_v33 = vsub.f32 %v2874_v9, %v1018_v6  ;;  %v1075_v18 = vsub.f32 %v2856_v63, %v1009_v48 }
 0x41d   : > { %2390 = vpow2.f32 %v1205_v19  ;;  %v1076_v11 = vsub.f32 %v2858_v58, %v1009_v48 }
 0x41e   : > { %v1207_v22 = vmul.f32 1.442695, %v1081_v5  ;;  %v1209_v29 = vmul.f32 1.442695, %v1082_v33  ;;  %v1195_v20 = vmul.f32 1.442695, %v1075_v18 }
 0x41f   : > { %v1197_v26 = vmul.f32 1.442695, %v1076_v11  ;;  %1215 = vadd.xlane.f32.xlu0 %v1214_v2  ;;  %v1012_v46 = vpop.xlane.xlu0 %1011  ;;  %v1003_v17 = vpop.xlane.xlu1 %1002  ;;  %v3617_v18 = vld [vmem:[#allocation18_spill] sm:$0xff]  ;;  %v3618_v11 = vld [vmem:[#allocation16_spill] sm:$0xff] }
 0x420   : > { %2392 = vpow2.f32 %v1207_v22  ;;  %v1077_v7 = vsub.f32 %v2870_v36, %v1012_v46  ;;  %v1078_v9 = vsub.f32 %v2872_v34, %v1012_v46  ;;  %v1071_v63 = vsub.f32 %v2866_v50, %v1003_v17  ;;  %v3619_v50 = vld [vmem:[#allocation17_spill] sm:$0xff]  ;;  %v3620_v46 = vld [vmem:[#allocation19_spill] sm:$0xff] }
 0x421   : > { %2394 = vpow2.f32 %v1209_v29  ;;  %v1072_v58 = vsub.f32 %v2868_v43, %v1003_v17 }
 0x422   : > { %2396 = vpow2.f32 %v1195_v20  ;;  %v1199_v19 = vmul.f32 1.442695, %v1077_v7  ;;  %v1201_v48 = vmul.f32 1.442695, %v1078_v9  ;;  %v1187_v5 = vmul.f32 1.442695, %v1071_v63 }
 0x423   : > { %2398 = vpow2.f32 %v1197_v26  ;;  %v1189_v10 = vmul.f32 1.442695, %v1072_v58  ;;  %v1006_v6 = vpop.xlane.xlu0 %1005  ;;  %v997_v33 = vpop.xlane.xlu1 %996  ;;  %v3621_v9 = vld [vmem:[#allocation20_spill] sm:$0xff] }
 0x424   : > { %2400 = vpow2.f32 %v1199_v19  ;;  %v1073_v22 = vsub.f32 %v2884_v45, %v1006_v6  ;;  %v1074_v36 = vsub.f32 %v3617_v18, %v1006_v6  ;;  %v1067_v34 = vsub.f32 %v3618_v11, %v997_v33 }
 0x425   : > { %2402 = vpow2.f32 %v1201_v48  ;;  %v1068_v29 = vsub.f32 %v3619_v50, %v997_v33 }
 0x426   : > { %2404 = vpow2.f32 %v1187_v5  ;;  %v1191_v43 = vmul.f32 1.442695, %v1073_v22  ;;  %v1193_v17 = vmul.f32 1.442695, %v1074_v36  ;;  %v1179_v2 = vmul.f32 1.442695, %v1067_v34 }
 0x427   : > { %2406 = vpow2.f32 %v1189_v10  ;;  %v1181_v20 = vmul.f32 1.442695, %v1068_v29  ;;  %v1000_v26 = vpop.xlane.xlu0 %999 }
 0x428   : > { %2408 = vpow2.f32 %v1191_v43  ;;  %v1069_v7 = vsub.f32 %v3620_v46, %v1000_v26  ;;  %v1070_v63 = vsub.f32 %v3621_v9, %v1000_v26 }
 0x429   : > { %v3114_v45 = vpop.eup %2388  ;;  %2410 = vpow2.f32 %v1193_v17 }
 0x42a   : > { %v3116_v58 = vpop.eup %2390  ;;  %2412 = vpow2.f32 %v1179_v2  ;;  %v1183_v19 = vmul.f32 1.442695, %v1069_v7  ;;  %v1185_v48 = vmul.f32 1.442695, %v1070_v63 }
 0x42b   : > { %2414 = vpow2.f32 %v1181_v20  ;;  %v1301_v5 = vadd.f32 %v3116_v58, %v3114_v45 }
 0x42c   : > { %2416 = vpow2.f32 %v1183_v19 }
 0x42d   : > { %v3120_v10 = vpop.eup %2392  ;;  %2418 = vpow2.f32 %v1185_v48  ;;  %1302 = vadd.xlane.f32.xlu1 %v1301_v5 }
 0x42e   : > { %v3122_v6 = vpop.eup %2394 }
 0x42f   : > { %v3124_v33 = vpop.eup %2396  ;;  %v1304_v22 = vadd.f32 %v3122_v6, %v3120_v10 }
 0x430   : > { %v3128_v18 = vpop.eup %2398 }
 0x431   : > { %v3130_v36 = vpop.eup %2400  ;;  %1305 = vadd.xlane.f32.xlu0 %v1304_v22  ;;  %v1295_v11 = vadd.f32 %v3128_v18, %v3124_v33 }
 0x432   : > { %v3134_v34 = vpop.eup %2402 }
 0x433   : > { %v3136_v50 = vpop.eup %2404  ;;  %1296 = vadd.xlane.f32.xlu1 %v1295_v11  ;;  %v1298_v29 = vadd.f32 %v3134_v34, %v3130_v36 }
 0x434   : > { %3622 = vst [vmem:[#allocation9_spill] sm:$0xff] %v3136_v50  ;;  %v3140_v43 = vpop.eup %2406 }
 0x435   : > { %v3142_v17 = vpop.eup %2408  ;;  %1299 = vadd.xlane.f32.xlu0 %v1298_v29  ;;  %v1289_v2 = vadd.f32 %v3140_v43, %v3136_v50 }
 0x436   : > { %3623 = vst [vmem:[#allocation15_spill] sm:$0xff] %v3142_v17  ;;  %v3146_v20 = vpop.eup %2410 }
 0x437   : > { %v3148_v26 = vpop.eup %2412  ;;  %1290 = vadd.xlane.f32.xlu1 %v1289_v2  ;;  %v1292_v46 = vadd.f32 %v3146_v20, %v3142_v17 }
 0x438   : > { %3624 = vst [vmem:[#allocation18_spill] sm:$0xff] %v3148_v26  ;;  %v3152_v7 = vpop.eup %2414 }
 0x439   : > { %3625 = vst [vmem:[#allocation16_spill] sm:$0xff] %v3152_v7  ;;  %v3154_v9 = vpop.eup %2416  ;;  %1293 = vadd.xlane.f32.xlu0 %v1292_v46  ;;  %v1283_v63 = vadd.f32 %v3152_v7, %v3148_v26 }
 0x43a   : > { %3626 = vst [vmem:[#allocation17_spill] sm:$0xff] %v3154_v9  ;;  %v3158_v19 = vpop.eup %2418 }
 0x43b   : > { %3627 = vst [vmem:[#allocation19_spill] sm:$0xff] %v3158_v19  ;;  %1284 = vadd.xlane.f32.xlu1 %v1283_v63  ;;  %v1286_v48 = vadd.f32 %v3158_v19, %v3154_v9 }
 0x43d   : > { %1287 = vadd.xlane.f32.xlu0 %v1286_v48 }
 0x476   : > { %v1255_v5 = vpop.xlane.xlu1 %1254 }
 0x477   : > { %2420 = vrcp.f32 %v1255_v5 }
 0x47a   : > { %v991_v22 = vpop.xlane.xlu1 %990 }
 0x47b   : > { %v1063_v11 = vsub.f32 %v2919_v51, %v991_v22  ;;  %v1064_v29 = vsub.f32 %v2923_v61, %v991_v22 }
 0x47c   : > { %v1258_v2 = vpop.xlane.xlu0 %1257 }
 0x47d   : > { %2422 = vrcp.f32 %v1258_v2  ;;  %v1171_v46 = vmul.f32 1.442695, %v1063_v11  ;;  %v1173_v50 = vmul.f32 1.442695, %v1064_v29 }
 0x47e   : > { %v1249_v17 = vpop.xlane.xlu1 %1248 }
 0x47f   : > { %2424 = vpow2.f32 %v1171_v46 }
 0x480   : > { %2426 = vpow2.f32 %v1173_v50  ;;  %v994_v26 = vpop.xlane.xlu0 %993 }
 0x481   : > { %v1065_v63 = vsub.f32 %v2939_v31, %v994_v26  ;;  %v1066_v9 = vsub.f32 %v2943_v47, %v994_v26  ;;  %2428 = vrcp.f32 %v1249_v17 }
 0x482   : > { %v985_v48 = vpop.xlane.xlu1 %984 }
 0x483   : > { %v1175_v7 = vmul.f32 1.442695, %v1065_v63  ;;  %v1177_v5 = vmul.f32 1.442695, %v1066_v9  ;;  %v1059_v19 = vsub.f32 %v2949_v39, %v985_v48  ;;  %v1060_v51 = vsub.f32 %v2953_v14, %v985_v48 }
 0x484   : > { %v1252_v61 = vpop.xlane.xlu0 %1251  ;;  %v2421_v50 = vpop.eup %2420 }
 0x485   : > { %2430 = vpow2.f32 %v1175_v7  ;;  %v1163_v22 = vmul.f32 1.442695, %v1059_v19  ;;  %v1165_v11 = vmul.f32 1.442695, %v1060_v51  ;;  %v1368_v14 = vmul.f32 %v2421_v50, %v2916_v56 }
 0x486   : > { %2432 = vpow2.f32 %v1177_v5  ;;  %v1243_v29 = vpop.xlane.xlu1 %1242 }
 0x487   : > { %2434 = vrcp.f32 %v1252_v61 }
 0x488   : > { %2436 = vpow2.f32 %v1163_v22  ;;  %v988_v31 = vpop.xlane.xlu0 %987 }
 0x489   : > { %2438 = vpow2.f32 %v1165_v11  ;;  %v1061_v47 = vsub.f32 %v2976_v0, %v988_v31  ;;  %v1062_v26 = vsub.f32 %v2980_v8, %v988_v31  ;;  %v1367_v0 = vmul.f32 %v2421_v50, %v2913_v53 }
 0x48a   : > { %v2423_v9 = vpop.eup %2422  ;;  %v979_v39 = vpop.xlane.xlu1 %978  ;;  %2440 = vrcp.f32 %v1243_v29 }
 0x48b   : > { %v1167_v17 = vmul.f32 1.442695, %v1061_v47  ;;  %v1169_v2 = vmul.f32 1.442695, %v1062_v26  ;;  %v1055_v7 = vsub.f32 %v2973_v60, %v979_v39  ;;  %v1056_v19 = vsub.f32 %v2986_v62, %v979_v39 }
 0x48c   : > { %v3173_v46 = vpop.eup %2424  ;;  %v1246_v63 = vpop.xlane.xlu0 %1245  ;;  %v1370_v48 = vmul.f32 %v2423_v9, %v2936_v59  ;;  %v1369_v8 = vmul.f32 %v2423_v9, %v2932_v41 }
 0x48d   : > { %v3178_v5 = vpop.eup %2426  ;;  %2442 = vpow2.f32 %v1167_v17  ;;  %v1155_v56 = vmul.f32 1.442695, %v1055_v7  ;;  %v1157_v51 = vmul.f32 1.442695, %v1056_v19 }
 0x48e   : > { %2444 = vpow2.f32 %v1169_v2  ;;  %v1418_v61 = vpack.c.bf16 %v1370_v48, %v1368_v14  ;;  %v1417_v60 = vpack.c.bf16 %v1369_v8, %v1367_v0  ;;  %v1237_v22 = vpop.xlane.xlu1 %1236  ;;  %v1277_v62 = vadd.f32 %v3178_v5, %v3173_v46  ;;  %v2429_v53 = vpop.eup %2428 }
 0x48f   : > { %2446 = vrcp.f32 %v1246_v63 }
 0x490   : > { %2448 = vpow2.f32 %v1155_v56  ;;  %1435 = vmatprep.subr.bf16.mxu1 %v1418_v61  ;;  %v982_v59 = vpop.xlane.xlu0 %981  ;;  %1278 = vadd.xlane.f32.xlu1 %v1277_v62 }
 0x491   : > { %2450 = vpow2.f32 %v1157_v51  ;;  %v1057_v41 = vsub.f32 %v3001_v16, %v982_v59  ;;  %v1058_v11 = vsub.f32 %v3012_v15, %v982_v59  ;;  %1436 = vmatpush1.bf16.xpose.msra.mxu1 %v1417_v60  ;;  %v1364_v15 = vmul.f32 %v2429_v53, %v2930_v30 }
 0x492   : > { %v3184_v29 = vpop.eup %2430  ;;  %v973_v50 = vpop.xlane.xlu1 %972  ;;  %2452 = vrcp.f32 %v1237_v22 }
 0x493   : > { %v3186_v31 = vpop.eup %2432  ;;  %v1159_v47 = vmul.f32 1.442695, %v1057_v41  ;;  %v1161_v26 = vmul.f32 1.442695, %v1058_v11  ;;  %v1051_v9 = vsub.f32 %v3022_v3, %v973_v50  ;;  %v1052_v39 = vsub.f32 %v3026_v25, %v973_v50 }
 0x494   : > { %v2435_v14 = vpop.eup %2434  ;;  %v1240_v17 = vpop.xlane.xlu0 %1239  ;;  %v1280_v16 = vadd.f32 %v3186_v31, %v3184_v29  ;;  %v1363_v3 = vmul.f32 %v2429_v53, %v2928_v24 }
 0x495   : > { %v3193_v2 = vpop.eup %2436  ;;  %2454 = vpow2.f32 %v1159_v47  ;;  %v1147_v7 = vmul.f32 1.442695, %v1051_v9  ;;  %v1149_v19 = vmul.f32 1.442695, %v1052_v39  ;;  %v1366_v63 = vmul.f32 %v2435_v14, %v2962_v52 }
 0x496   : > { %v3196_v48 = vpop.eup %2438  ;;  %2456 = vpow2.f32 %v1161_v26  ;;  %1281 = vadd.xlane.f32.xlu0 %v1280_v16  ;;  %v1365_v25 = vmul.f32 %v2435_v14, %v2958_v38  ;;  %v1231_v0 = vpop.xlane.xlu1 %1230 }
 0x497   : > { %2458 = vrcp.f32 %v1240_v17  ;;  %v1416_v8 = vpack.c.bf16 %v1366_v63, %v1364_v15  ;;  %v1271_v30 = vadd.f32 %v3196_v48, %v3193_v2  ;;  %v2441_v61 = vpop.eup %2440 }
 0x498   : > { %2460 = vpow2.f32 %v1147_v7  ;;  %v976_v56 = vpop.xlane.xlu0 %975  ;;  %v1415_v51 = vpack.c.bf16 %v1365_v25, %v1363_v3  ;;  %v1359_v47 = vmul.f32 %v2441_v61, %v2965_v4 }
 0x499   : > { %2462 = vpow2.f32 %v1149_v19  ;;  %1437 = vmatprep.subr.bf16.mxu1 %v1416_v8  ;;  %v1053_v52 = vsub.f32 %v3045_v57, %v976_v56  ;;  %v1054_v60 = vsub.f32 %v3048_v54, %v976_v56  ;;  %1272 = vadd.xlane.f32.xlu1 %v1271_v30  ;;  %v1360_v57 = vmul.f32 %v2441_v61, %v2970_v55 }
 0x49a   : > { %v3204_v24 = vpop.eup %2442  ;;  %1438 = vmatpush1.bf16.xpose.msra.mxu1 %v1415_v51  ;;  %v1225_v38 = vpop.xlane.xlu1 %1224  ;;  %2464 = vrcp.f32 %v1231_v0 }
 0x49b   : > { %v3206_v22 = vpop.eup %2444  ;;  %v1151_v62 = vmul.f32 1.442695, %v1053_v52  ;;  %v1153_v59 = vmul.f32 1.442695, %v1054_v60  ;;  %2466 = vrcp.f32 %v1225_v38 }
 0x49c   : > { %v2447_v53 = vpop.eup %2446  ;;  %v1234_v41 = vpop.xlane.xlu0 %1233  ;;  %v1274_v11 = vadd.f32 %v3206_v22, %v3204_v24 }
 0x49d   : > { %v3211_v50 = vpop.eup %2448  ;;  %2468 = vpow2.f32 %v1151_v62  ;;  %v1362_v54 = vmul.f32 %v2447_v53, %v2998_v28  ;;  %v1361_v26 = vmul.f32 %v2447_v53, %v2993_v49 }
 0x49e   : > { %v3216_v9 = vpop.eup %2450  ;;  %2470 = vpow2.f32 %v1153_v59  ;;  %1275 = vadd.xlane.f32.xlu0 %v1274_v11  ;;  %v1219_v15 = vpop.xlane.xlu1 %1218 }
 0x49f   : > { %2472 = vrcp.f32 %v1234_v41  ;;  %v1414_v39 = vpack.c.bf16 %v1362_v54, %v1360_v57  ;;  %v1413_v14 = vpack.c.bf16 %v1361_v26, %v1359_v47  ;;  %v1265_v17 = vadd.f32 %v3216_v9, %v3211_v50  ;;  %v2453_v16 = vpop.eup %2452 }
 0x4a0   : > { %v1228_v55 = vpop.xlane.xlu0 %1227  ;;  %v1356_v63 = vmul.f32 %v2453_v16, %v3009_v37  ;;  %v1355_v0 = vmul.f32 %v2453_v16, %v3004_v32 }
 0x4a1   : > { %1439 = vmatprep.subr.bf16.mxu1 %v1414_v39  ;;  %2474 = vrcp.f32 %v1228_v55  ;;  %1266 = vadd.xlane.f32.xlu1 %v1265_v17 }
 0x4a2   : > { %v3220_v28 = vpop.eup %2454  ;;  %1440 = vmatpush1.bf16.xpose.msra.mxu1 %v1413_v14 }
 0x4a3   : > { %v3222_v4 = vpop.eup %2456 }
 0x4a4   : > { %v2459_v49 = vpop.eup %2458  ;;  %v1222_v7 = vpop.xlane.xlu0 %1221  ;;  %v1268_v19 = vadd.f32 %v3222_v4, %v3220_v28 }
 0x4a5   : > { %v3227_v3 = vpop.eup %2460  ;;  %2476 = vrcp.f32 %v1222_v7  ;;  %v1358_v25 = vmul.f32 %v2459_v49, %v3036_v40  ;;  %v1357_v8 = vmul.f32 %v2459_v49, %v3031_v27  ;;  %v1213_v27 = vpop.xlane.xlu1 %1212  ;;  %v3631_v7 = vld [vmem:[#allocation11_spill] sm:$0xff] }
 0x4a6   : > { %v3232_v30 = vpop.eup %2462  ;;  %1269 = vadd.xlane.f32.xlu0 %v1268_v19  ;;  %2478 = vrcp.f32 %v1219_v15 }
 0x4a7   : > { %v1412_v56 = vpack.c.bf16 %v1358_v25, %v1356_v63  ;;  %v1411_v51 = vpack.c.bf16 %v1357_v8, %v1355_v0  ;;  %v1259_v61 = vadd.f32 %v3232_v30, %v3227_v3  ;;  %v2465_v52 = vpop.eup %2464 }
 0x4a8   : > { %v2467_v37 = vpop.eup %2466  ;;  %v1216_v40 = vpop.xlane.xlu0 %1215  ;;  %v1352_v59 = vmul.f32 %v2465_v52, %v3042_v23  ;;  %v1351_v41 = vmul.f32 %v2465_v52, %v3038_v35  ;;  %v3629_v35 = vld [vmem:[#allocation8_spill] sm:$0xff] }
 0x4a9   : > { %1441 = vmatprep.subr.bf16.mxu1 %v1412_v56  ;;  %1260 = vadd.xlane.f32.xlu1 %v1259_v61  ;;  %2480 = vrcp.f32 %v1216_v40  ;;  %v1348_v26 = vmul.f32 %v2467_v37, %v3056_v1  ;;  %v240_v1 = vld [vmem:[%s3547_s2 + $0x30] sm:$0xff]  ;;  %v242_v56 = vld [vmem:[%s3547_s2 + $0x40] sm:$0xff]  ;;  %v3632_v61 = vld [vmem:[#allocation13_spill] sm:$0xff] }
 0x4aa   : > { %v3236_v60 = vpop.eup %2468  ;;  %1442 = vmatpush1.bf16.xpose.msra.mxu1 %v1411_v51  ;;  %2482 = vrcp.f32 %v1213_v27  ;;  %v3633_v27 = vld [vmem:[#allocation12_spill] sm:$0xff] }
 0x4ab   : > { %v3238_v32 = vpop.eup %2470 }
 0x4ac   : > { %v2473_v38 = vpop.eup %2472  ;;  %v1262_v62 = vadd.f32 %v3238_v32, %v3236_v60 }
 0x4ad   : > { %v1354_v53 = vmul.f32 %v2473_v38, %v3062_v44  ;;  %v1353_v11 = vmul.f32 %v2473_v38, %v3058_v12  ;;  %v3628_v44 = vld [vmem:[#allocation6_spill] sm:$0xff] }
 0x4ae   : > { %v2475_v57 = vpop.eup %2474  ;;  %1263 = vadd.xlane.f32.xlu0 %v1262_v62  ;;  %v3630_v12 = vld [vmem:[#allocation10_spill] sm:$0xff] }
 0x4af   : > { %v1410_v54 = vpack.c.bf16 %v1354_v53, %v1352_v59  ;;  %v1409_v47 = vpack.c.bf16 %v1353_v11, %v1351_v41  ;;  %v1350_v39 = vmul.f32 %v2475_v57, %v3074_v21  ;;  %v1349_v55 = vmul.f32 %v2475_v57, %v3628_v44  ;;  %v3634_v62 = vld [vmem:[#allocation14_spill] sm:$0xff]  ;;  %v243_v53 = vld [vmem:[%s3547_s2 + $0x48] sm:$0xff]  ;;  %v241_v57 = vld [vmem:[%s3547_s2 + $0x38] sm:$0xff] }
 0x4b0   : > { %v1347_v49 = vmul.f32 %v2467_v37, %v3630_v12  ;;  %v3635_v44 = vld [vmem:[#allocation7_spill] sm:$0xff] }
 0x4b1   : > { %1443 = vmatprep.subr.bf16.mxu1 %v1410_v54  ;;  %v1408_v14 = vpack.c.bf16 %v1350_v39, %v1348_v26 }
 0x4b2   : > { %v2477_v17 = vpop.eup %2476  ;;  %1444 = vmatpush1.bf16.xpose.msra.mxu1 %v1409_v47  ;;  %v1407_v21 = vpack.c.bf16 %v1349_v55, %v1347_v49  ;;  %v251_v47 = vld [vmem:[%s3547_s2 + $0x88] sm:$0xff] }
 0x4b3   : > { %1445 = vmatprep.subr.bf16.mxu1 %v1408_v14  ;;  %v2479_v23 = vpop.eup %2478  ;;  %v1346_v16 = vmul.f32 %v2477_v17, %v3629_v35  ;;  %v1345_v52 = vmul.f32 %v2477_v17, %v3632_v61  ;;  %v250_v17 = vld [vmem:[%s3547_s2 + $0x80] sm:$0xff] }
 0x4b4   : > { %v1344_v19 = vmul.f32 %v2479_v23, %v3631_v7  ;;  %v1343_v38 = vmul.f32 %v2479_v23, %v3633_v27  ;;  %v248_v7 = vld [vmem:[%s3547_s2 + $0x70] sm:$0xff] }
 0x4b6   : > { %v1303_v15 = vpop.xlane.xlu1 %1302  ;;  %v1406_v63 = vpack.c.bf16 %v1346_v16, %v1344_v19  ;;  %v2481_v25 = vpop.eup %2480  ;;  %v1405_v41 = vpack.c.bf16 %v1345_v52, %v1343_v38  ;;  %v249_v16 = vld [vmem:[%s3547_s2 + $0x78] sm:$0xff] }
 0x4b7   : > { %2484 = vrcp.f32 %v1303_v15  ;;  %v2483_v8 = vpop.eup %2482  ;;  %v1342_v37 = vmul.f32 %v2481_v25, %v3096_v42  ;;  %v3268_v54 = vpop.f32.mrf.mxu1  ;;  %v1341_v39 = vmul.f32 %v2481_v25, %v3092_v13 }
 0x4b8   : > { %v1340_v59 = vmul.f32 %v2483_v8, %v3634_v62  ;;  %v1339_v55 = vmul.f32 %v2483_v8, %v3635_v44  ;;  %v247_v8 = vld [vmem:[%s3547_s2 + $0x68] sm:$0xff] }
 0x4b9   : > { %v577_v14 = vpop.f32.mrf.mxu1 }
 0x4ba   : > { %1446 = vmatpush1.bf16.xpose.msra.mxu1 %v1407_v21  ;;  %1585 = vperm.xlu1 %2308, %v240_v1   ;;  %v1306_v0 = vpop.xlane.xlu0 %1305  ;;  %v1404_v11 = vpack.c.bf16 %v1342_v37, %v1340_v59  ;;  %v1403_v49 = vpack.c.bf16 %v1341_v39, %v1339_v55  ;;  %v253_v59 = vld [vmem:[%s3547_s2 + $0x98] sm:$0xff]  ;;  %v3636_v39 = vld [vmem:[#allocation15_spill] sm:$0xff]  ;;  %v3639_v55 = vld [vmem:[#allocation16_spill] sm:$0xff] }
 0x4bb   : > { %1447 = vmatprep.subr.bf16.mxu1 %v1406_v63  ;;  %2486 = vrcp.f32 %v1306_v0  ;;  %v3278_v35 = vpop.f32.mrf.mxu1 }
 0x4bc   : > { %v1297_v51 = vpop.xlane.xlu1 %1296  ;;  %v584_v13 = vpack.c.bf16 %v3278_v35, %v3268_v54 }
 0x4bd   : > { %2488 = vrcp.f32 %v1297_v51  ;;  %v581_v15 = vpop.f32.mrf.mxu1 }
 0x4be   : > { %1599 = vperm.xlu1 %2308, %v242_v56   ;;  %v1300_v40 = vpop.xlane.xlu0 %1299  ;;  %v585_v21 = vpack.c.bf16 %v581_v15, %v577_v14  ;;  %v3637_v14 = vld [vmem:[#allocation19_spill] sm:$0xff] }
 0x4bf   : > { %2490 = vrcp.f32 %v1300_v40  ;;  %v245_v40 = vld [vmem:[%s3547_s2 + $0x58] sm:$0xff] }
 0x4c0   : > { %v1291_v26 = vpop.xlane.xlu1 %1290  ;;  %1467 = vmatprep.mubr.bf16.mxu1 %v585_v21 }
 0x4c2   : > { %1448 = vmatpush1.bf16.xpose.msra.mxu1 %v1405_v41  ;;  %1604 = vperm.xlu1 %2308, %v243_v53   ;;  %v1294_v42 = vpop.xlane.xlu0 %1293 }
 0x4c3   : > { %1449 = vmatprep.subr.bf16.mxu1 %v1404_v11  ;;  %2492 = vrcp.f32 %v1294_v42 }
 0x4c4   : > { %1590 = vperm.xlu0 %2307, %v241_v57   ;;  %v2485_v23 = vpop.eup %2484  ;;  %2494 = vrcp.f32 %v1291_v26  ;;  %v1285_v61 = vpop.xlane.xlu1 %1284 }
 0x4c5   : > { %v1400_v19 = vmul.f32 %v2485_v23, %v3116_v58  ;;  %v1399_v58 = vmul.f32 %v2485_v23, %v3114_v45  ;;  %v244_v45 = vld [vmem:[%s3547_s2 + $0x50] sm:$0xff]  ;;  %v3638_v23 = vld [vmem:[#allocation9_spill] sm:$0xff] }
 0x4c6   : > { %1650 = vperm.xlu1 %2308, %v251_v47   ;;  %v1288_v25 = vpop.xlane.xlu0 %1287 }
 0x4c7   : > { %2496 = vrcp.f32 %v1288_v25 }
 0x4c8   : > { %v2487_v12 = vpop.eup %2486  ;;  %1645 = vperm.xlu0 %2307, %v250_v17   ;;  %2498 = vrcp.f32 %v1285_v61 }
 0x4c9   : > { %v1402_v1 = vmul.f32 %v2487_v12, %v3122_v6  ;;  %v1401_v0 = vmul.f32 %v2487_v12, %v3120_v10  ;;  %v246_v6 = vld [vmem:[%s3547_s2 + $0x60] sm:$0xff] }
 0x4ca   : > { %v2489_v63 = vpop.eup %2488  ;;  %1450 = vmatpush1.bf16.xpose.msra.mxu1 %v1403_v49  ;;  %1640 = vperm.xlu1 %2308, %v249_v16   ;;  %v3641_v49 = vld [vmem:[#allocation18_spill] sm:$0xff] }
 0x4cb   : > { %v1434_v56 = vpack.c.bf16 %v1402_v1, %v1400_v19  ;;  %v1396_v52 = vmul.f32 %v2489_v63, %v3128_v18  ;;  %v1433_v37 = vpack.c.bf16 %v1401_v0, %v1399_v58  ;;  %v252_v18 = vld [vmem:[%s3547_s2 + $0x90] sm:$0xff]  ;;  %v1395_v41 = vmul.f32 %v2489_v63, %v3124_v33  ;;  %v3640_v33 = vld [vmem:[#allocation17_spill] sm:$0xff] }
 0x4cc   : > { %v2491_v51 = vpop.eup %2490  ;;  %1635 = vperm.xlu0 %2307, %v248_v7  }
 0x4cd   : > { %1451 = vmatprep.subr.bf16.mxu1 %v1434_v56  ;;  %v1398_v10 = vmul.f32 %v2491_v51, %v3134_v34  ;;  %v1397_v62 = vmul.f32 %v2491_v51, %v3130_v36 }
 0x4ce   : > { %1630 = vperm.xlu1 %2308, %v247_v8  }
 0x4cf   : > { %v1432_v27 = vpack.c.bf16 %v1398_v10, %v1396_v52  ;;  %v1431_v57 = vpack.c.bf16 %v1397_v62, %v1395_v41 }
 0x4d0   : > { %1625 = vperm.xlu0 %2307, %v246_v6   ;;  %v2493_v38 = vpop.eup %2492 }
 0x4d1   : > { %v2495_v34 = vpop.eup %2494  ;;  %v1394_v53 = vmul.f32 %v2493_v38, %v3146_v20  ;;  %v1393_v36 = vmul.f32 %v2493_v38, %v3636_v39 }
 0x4d2   : > { %1452 = vmatpush2.bf16.xpose.msra.mxu1 %v1433_v37  ;;  %1620 = vperm.xlu1 %2308, %v245_v40   ;;  %v1392_v11 = vmul.f32 %v2495_v34, %v3140_v43  ;;  %v1391_v44 = vmul.f32 %v2495_v34, %v3638_v23  ;;  %v3644_v23 = vld [vmem:[#allocation3_spill] sm:$0xff] }
 0x4d3   : > { %1453 = vmatprep.subr.bf16.mxu1 %v1432_v27 }
 0x4d4   : > { %1615 = vperm.xlu0 %2307, %v244_v45   ;;  %v1430_v42 = vpack.c.bf16 %v1394_v53, %v1392_v11  ;;  %v2497_v47 = vpop.eup %2496  ;;  %v1429_v16 = vpack.c.bf16 %v1393_v36, %v1391_v44 }
 0x4d5   : > { %v2499_v26 = vpop.eup %2498  ;;  %v1390_v17 = vmul.f32 %v2497_v47, %v3637_v14  ;;  %v1389_v43 = vmul.f32 %v2497_v47, %v3640_v33  ;;  %v3646_v33 = vld [vmem:[#allocation5_spill] sm:$0xff] }
 0x4d6   : > { %1912 = vperm.xlu1 %2308, %v252_v18   ;;  %v1388_v20 = vmul.f32 %v2499_v26, %v3639_v55  ;;  %v1387_v15 = vmul.f32 %v2499_v26, %v3641_v49 }
 0x4d8   : > { %1917 = vperm.xlu0 %2307, %v253_v59   ;;  %v1428_v12 = vpack.c.bf16 %v1390_v17, %v1388_v20  ;;  %v1427_v7 = vpack.c.bf16 %v1389_v43, %v1387_v15  ;;  %v3645_v20 = vld [vmem:[#allocation4_spill] sm:$0xff] }
 0x4da   : > { %1454 = vmatpush2.bf16.xpose.msra.mxu1 %v1431_v57 }
 0x4db   : > { %1455 = vmatprep.subr.bf16.mxu1 %v1430_v42 }
 0x4e2   : > { %1456 = vmatpush2.bf16.xpose.msra.mxu1 %v1429_v16 }
 0x4e3   : > { %1457 = vmatprep.subr.bf16.mxu1 %v1428_v12 }
 0x4ea   : > { %1458 = vmatpush2.bf16.xpose.msra.mxu1 %v1427_v7 }
 0x519   : > { %v1279_v19 = vpop.xlane.xlu1 %1278 }
 0x51a   : > { %2500 = vrcp.f32 %v1279_v19 }
 0x51f   : > { %v1282_v1 = vpop.xlane.xlu0 %1281 }
 0x520   : > { %2502 = vrcp.f32 %v1282_v1 }
 0x522   : > { %v1273_v21 = vpop.xlane.xlu1 %1272 }
 0x523   : > { %2504 = vrcp.f32 %v1273_v21 }
 0x527   : > { %v1276_v63 = vpop.xlane.xlu0 %1275  ;;  %v2501_v25 = vpop.eup %2500 }
 0x528   : > { %2506 = vrcp.f32 %v1276_v63  ;;  %v1384_v56 = vmul.f32 %v2501_v25, %v3178_v5  ;;  %v1383_v61 = vmul.f32 %v2501_v25, %v3173_v46 }
 0x52a   : > { %v1267_v0 = vpop.xlane.xlu1 %1266 }
 0x52b   : > { %2508 = vrcp.f32 %v1267_v0 }
 0x52d   : > { %v2503_v8 = vpop.eup %2502 }
 0x52e   : > { %v1386_v51 = vmul.f32 %v2503_v8, %v3186_v31  ;;  %v1385_v58 = vmul.f32 %v2503_v8, %v3184_v29 }
 0x52f   : > { %v1270_v6 = vpop.xlane.xlu0 %1269 }
 0x530   : > { %2510 = vrcp.f32 %v1270_v6  ;;  %v1426_v52 = vpack.c.bf16 %v1386_v51, %v1384_v56  ;;  %v1425_v10 = vpack.c.bf16 %v1385_v58, %v1383_v61  ;;  %v2505_v37 = vpop.eup %2504 }
 0x531   : > { %v1380_v45 = vmul.f32 %v2505_v37, %v3196_v48  ;;  %v1379_v31 = vmul.f32 %v2505_v37, %v3193_v2 }
 0x532   : > { %1459 = vmatprep.subr.bf16.mxu1 %v1426_v52  ;;  %v1261_v40 = vpop.xlane.xlu1 %1260 }
 0x533   : > { %1460 = vmatpush2.bf16.xpose.msra.mxu1 %v1425_v10  ;;  %2512 = vrcp.f32 %v1261_v40 }
 0x535   : > { %v2507_v27 = vpop.eup %2506 }
 0x536   : > { %v1382_v5 = vmul.f32 %v2507_v27, %v3206_v22  ;;  %v1381_v46 = vmul.f32 %v2507_v27, %v3204_v24 }
 0x537   : > { %v1264_v38 = vpop.xlane.xlu0 %1263 }
 0x538   : > { %2514 = vrcp.f32 %v1264_v38  ;;  %v1424_v29 = vpack.c.bf16 %v1382_v5, %v1380_v45  ;;  %v1423_v18 = vpack.c.bf16 %v1381_v46, %v1379_v31  ;;  %v2509_v34 = vpop.eup %2508 }
 0x539   : > { %v1376_v59 = vmul.f32 %v2509_v34, %v3216_v9  ;;  %v1375_v48 = vmul.f32 %v2509_v34, %v3211_v50  ;;  %v3642_v50 = vmov 0  }
 0x53a   : > { %1461 = vmatprep.subr.bf16.mxu1 %v1424_v29 }
 0x53b   : > { %1462 = vmatpush2.bf16.xpose.msra.mxu1 %v1423_v18 }
 0x53d   : > { %v2511_v62 = vpop.eup %2510 }
 0x53e   : > { %v1378_v53 = vmul.f32 %v2511_v62, %v3222_v4  ;;  %v1377_v22 = vmul.f32 %v2511_v62, %v3220_v28 }
 0x540   : > { %v1422_v41 = vpack.c.bf16 %v1378_v53, %v1376_v59  ;;  %v1421_v2 = vpack.c.bf16 %v1377_v22, %v1375_v48  ;;  %v2513_v24 = vpop.eup %2512 }
 0x541   : > { %v1372_v57 = vmul.f32 %v2513_v24, %v3232_v30  ;;  %v1371_v47 = vmul.f32 %v2513_v24, %v3227_v3  ;;  %v2313_v3 = vld [vmem:[%s3546_s1 + $0x20] sm:$0xff]  }
 0x542   : > { %1463 = vmatprep.subr.bf16.mxu1 %v1422_v41 }
 0x543   : > { %1464 = vmatpush2.bf16.xpose.msra.mxu1 %v1421_v2 }
 0x545   : > { %v2515_v11 = vpop.eup %2514 }
 0x546   : > { %v1374_v42 = vmul.f32 %v2515_v11, %v3238_v32  ;;  %v1373_v9 = vmul.f32 %v2515_v11, %v3236_v60 }
 0x548   : > { %v1420_v26 = vpack.c.bf16 %v1374_v42, %v1372_v57  ;;  %v1419_v4 = vpack.c.bf16 %v1373_v9, %v1371_v47 }
 0x54a   : > { %1465 = vmatprep.subr.bf16.mxu1 %v1420_v26  ;;  %v1586_v26 = vpop.permute.xlu1 %1585 }
 0x54b   : > { %1466 = vmatpush2.bf16.xpose.msra.mxu1 %v1419_v4 }
 0x54e   : > { %v1600_v4 = vpop.permute.xlu1 %1599 }
 0x552   : > { %1468 = vmatmul.mubr.bf16.vlgmr.msra.gmra.mxu1 %v584_v13  ;;  %v3643_v13 = vld [vmem:[#allocation2_spill] sm:$0xff] }
 0x553   : > { %1717 = vmatprep.mubr.bf16.mxu1 %v3642_v50 }
 0x612   : > { %v1469_v28 = vpop.f32.mrf.mxu1 }
 0x614   : > { %v1471_v39 = vpop.f32.mrf.mxu1 }
 0x616   : > { %v1473_v36 = vpop.f32.mrf.mxu1 }
 0x617   : > { %v1478_v32 = vpack.c.bf16 %v1473_v36, %v1469_v28 }
 0x618   : > { %v1475_v30 = vpop.f32.mrf.mxu1 }
 0x619   : > { %v1479_v14 = vpack.c.bf16 %v1475_v30, %v1471_v39 }
 0x61b   : > { %1502 = vmatprep.subr.bf16.mxu0 %v1479_v14  ;;  %v1591_v14 = vpop.permute.xlu0 %1590 }
 0x61c   : > { %1503 = vmatpush1.bf16.msra.mxu0 %v1478_v32 }
 0x61f   : > { %2267 = vmatmul.mubr.msk.bf16.vlgmr.msra.gmra.mxu0 %vm431_vm7, %v2313_v3 }
 0x620   : > { %1961 = vmatprep.mubr.bf16.mxu0 %v3642_v50 }
 0x6df   : > { %v1522_v60 = vpop.f32.mrf.mxu0 }
 0x6e0   : > { %v3348_v17 = vadd.f32 %v1522_v60, %v3643_v13 }
 0x6e1   : > { %v1524_v54 = vpop.f32.mrf.mxu0 }
 0x6e2   : > { %v3354_v16 = vadd.f32 %v1524_v54, %v3645_v20 }
 0x6e3   : > { %v1526_v35 = vpop.f32.mrf.mxu0 }
 0x6e4   : > { %v3351_v44 = vadd.f32 %v1526_v35, %v3644_v23  ;;  %v1605_v35 = vpop.permute.xlu1 %1604 }
 0x6e5   : > { %v1528_v55 = vpop.f32.mrf.mxu0 }
 0x6e6   : > { %v1535_v12 = vadd.f32 %v3351_v44, %v3348_v17  ;;  %v3359_v43 = vadd.f32 %v1528_v55, %v3646_v33 }
 0x6e8   : > { %v1536_v49 = vrot.slane %v1535_v12, 4  ;;  %v1542_v15 = vadd.f32 %v3359_v43, %v3354_v16 }
 0x6ea   : > { %v1537_v7 = vadd.f32 %v1536_v49, %v1535_v12  ;;  %v1543_v19 = vrot.slane %v1542_v15, 4 }
 0x6ec   : > { %v1538_v1 = vrot.slane %v1537_v7, 2  ;;  %v1544_v21 = vadd.f32 %v1543_v19, %v1542_v15  ;;  %v2315_v19 = vld [vmem:[%s3546_s1 + $0x30] sm:$0xff]  }
 0x6ee   : > { %v1539_v63 = vadd.f32 %v1538_v1, %v1537_v7  ;;  %v1545_v25 = vrot.slane %v1544_v21, 2  ;;  %v2314_v7 = vld [vmem:[%s3546_s1 + $0x28] sm:$0xff]   ;;  %v2316_v1 = vld [vmem:[%s3546_s1 + $0x38] sm:$0xff]  }
 0x6f0   : > { %v1540_v0 = vrot.slane %v1539_v63, 1  ;;  %v1546_v8 = vadd.f32 %v1545_v25, %v1544_v21  ;;  %v2317_v21 = vld [vmem:[%s3546_s1 + $0x40] sm:$0xff]   ;;  %v3386_v25 = vpop.permute.xlu1 %1650 }
 0x6f2   : > { %v1541_v56 = vadd.f32 %v1540_v0, %v1539_v63  ;;  %v1547_v51 = vrot.slane %v1546_v8, 1  ;;  %v1646_v63 = vpop.permute.xlu0 %1645 }
 0x6f4   : > { %v1549_v61 = vmul.f32 0.0625, %v1541_v56  ;;  %v1548_v58 = vadd.f32 %v1547_v51, %v1546_v8  ;;  %v1641_v51 = vpop.permute.xlu1 %1640 }
 0x6f6   : > { %v1551_v6 = vsub.f32 %v3348_v17, %v1549_v61  ;;  %v1553_v52 = vsub.f32 %v3351_v44, %v1549_v61  ;;  %v1550_v10 = vmul.f32 0.0625, %v1548_v58  ;;  %v1636_v8 = vpop.permute.xlu0 %1635 }
 0x6f8   : > { %v1555_v37 = vmul.f32 %v1551_v6, %v1551_v6  ;;  %v1557_v40 = vmul.f32 %v1553_v52, %v1553_v52  ;;  %v1552_v27 = vsub.f32 %v3354_v16, %v1550_v10  ;;  %v1554_v45 = vsub.f32 %v3359_v43, %v1550_v10  ;;  %v1631_v10 = vpop.permute.xlu1 %1630 }
 0x6fa   : > { %v1559_v5 = vadd.f32 %v1557_v40, %v1555_v37  ;;  %v1556_v31 = vmul.f32 %v1552_v27, %v1552_v27  ;;  %v1558_v46 = vmul.f32 %v1554_v45, %v1554_v45 }
 0x6fc   : > { %v1560_v38 = vrot.slane %v1559_v5, 4  ;;  %v1566_v29 = vadd.f32 %v1558_v46, %v1556_v31  ;;  %v1621_v31 = vpop.permute.xlu1 %1620 }
 0x6fe   : > { %v1561_v18 = vadd.f32 %v1560_v38, %v1559_v5  ;;  %v1567_v34 = vrot.slane %v1566_v29, 4 }
 0x700   : > { %v1562_v62 = vrot.slane %v1561_v18, 2  ;;  %v1568_v59 = vadd.f32 %v1567_v34, %v1566_v29 }
 0x702   : > { %v1563_v53 = vadd.f32 %v1562_v62, %v1561_v18  ;;  %v1569_v48 = vrot.slane %v1568_v59, 2 }
 0x704   : > { %v1564_v22 = vrot.slane %v1563_v53, 1  ;;  %v1570_v41 = vadd.f32 %v1569_v48, %v1568_v59 }
 0x706   : > { %v1565_v2 = vadd.f32 %v1564_v22, %v1563_v53  ;;  %v1571_v24 = vrot.slane %v1570_v41, 1 }
 0x708   : > { %v1573_v11 = vmul.f32 0.0625, %v1565_v2  ;;  %v1572_v57 = vadd.f32 %v1571_v24, %v1570_v41 }
 0x70a   : > { %v1575_v42 = vadd.f32 1e-05, %v1573_v11  ;;  %v1574_v47 = vmul.f32 0.0625, %v1572_v57 }
 0x70c   : > { %2516 = vrsqrt.f32 %v1575_v42  ;;  %v1576_v9 = vadd.f32 1e-05, %v1574_v47 }
 0x70e   : > { %2518 = vrsqrt.f32 %v1576_v9 }
 0x719   : > { %v2517_v28 = vpop.eup %2516 }
 0x71a   : > { %v1579_v39 = vmul.f32 %v2517_v28, %v1551_v6  ;;  %v1581_v36 = vmul.f32 %v2517_v28, %v1553_v52  ;;  %v1626_v6 = vpop.permute.xlu0 %1625 }
 0x71b   : > { %v2519_v30 = vpop.eup %2518 }
 0x71c   : > { %v1595_v32 = vmul.f32 %v1591_v14, %v1581_v36  ;;  %v1582_v3 = vmul.f32 %v2519_v30, %v1554_v45  ;;  %v1580_v60 = vmul.f32 %v2519_v30, %v1552_v27  ;;  %v1593_v54 = vmul.f32 %v1586_v26, %v1579_v39 }
 0x71e   : > { %v1594_v13 = vmul.f32 %v1586_v26, %v1580_v60  ;;  %v1596_v23 = vmul.f32 %v1591_v14, %v1582_v3  ;;  %v1607_v55 = vadd.f32 %v1600_v4, %v1593_v54  ;;  %v1609_v20 = vadd.f32 %v1605_v35, %v1595_v32  ;;  %v1616_v27 = vpop.permute.xlu0 %1615 }
 0x720   : > { %v1608_v12 = vadd.f32 %v1600_v4, %v1594_v13  ;;  %v1610_v33 = vadd.f32 %v1605_v35, %v1596_v23  ;;  %v1611_v15 = vpack.c.bf16 %v1609_v20, %v1607_v55 }
 0x722   : > { %v1612_v49 = vpack.c.bf16 %v1610_v33, %v1608_v12 }
 0x724   : > { %1699 = vmatprep.subr.bf16.mxu1 %v1612_v49 }
 0x725   : > { %1700 = vmatpush1.bf16.msra.mxu1 %v1611_v15 }
 0x728   : > { %2272 = vmatmul.mubr.msk.bf16.vlgmr.msra.gmra.mxu1 %vm431_vm7, %v2314_v7 }
 0x729   : > { %1727 = vmatprep.mubr.bf16.mxu1 %v3642_v50 }
 0x730   : > { %2273 = vmatmul.mubr.msk.bf16.gmra.mxu1 %vm431_vm7, %v2315_v19 }
 0x731   : > { %1737 = vmatprep.mubr.bf16.mxu1 %v3642_v50 }
 0x738   : > { %2274 = vmatmul.mubr.msk.bf16.gmra.mxu1 %vm431_vm7, %v2316_v1 }
 0x739   : > { %1747 = vmatprep.mubr.bf16.mxu1 %v3642_v50 }
 0x740   : > { %2275 = vmatmul.mubr.msk.bf16.gmra.mxu1 %vm431_vm7, %v2317_v21 }
 0x7e8   : > { %v1719_v0 = vpop.f32.mrf.mxu1 }
 0x7e9   : > { %v3394_v18 = vadd.f32 %v1719_v0, %v1616_v27 }
 0x7ea   : > { %v1721_v56 = vpop.f32.mrf.mxu1 }
 0x7eb   : > { %v3388_v45 = vadd.f32 %v1721_v56, %v1616_v27  ;;  %v1774_v57 = vmul.f32 0.044715, %v3394_v18 }
 0x7ec   : > { %v1723_v61 = vpop.f32.mrf.mxu1 }
 0x7ed   : > { %v1775_v62 = vmul.f32 0.044715, %v3388_v45  ;;  %v3398_v59 = vadd.f32 %v1723_v61, %v1621_v31  ;;  %v1790_v13 = vmul.f32 %v1774_v57, %v3394_v18 }
 0x7ee   : > { %v1725_v58 = vpop.f32.mrf.mxu1 }
 0x7ef   : > { %v3392_v38 = vadd.f32 %v1725_v58, %v1621_v31  ;;  %v1791_v9 = vmul.f32 %v1775_v62, %v3388_v45  ;;  %v1776_v26 = vmul.f32 0.044715, %v3398_v59 }
 0x7f0   : > { %v1729_v52 = vpop.f32.mrf.mxu1 }
 0x7f1   : > { %v1777_v41 = vmul.f32 0.044715, %v3392_v38  ;;  %v3414_v4 = vadd.f32 %v1729_v52, %v1626_v6  ;;  %v3431_v12 = vmul.f32 %v1791_v9, %v3388_v45  ;;  %v1792_v19 = vmul.f32 %v1776_v26, %v3398_v59 }
 0x7f2   : > { %v1731_v37 = vpop.f32.mrf.mxu1 }
 0x7f3   : > { %v3400_v48 = vadd.f32 %v1731_v37, %v1626_v6  ;;  %v1793_v3 = vmul.f32 %v1777_v41, %v3392_v38  ;;  %v1778_v33 = vmul.f32 0.044715, %v3414_v4 }
 0x7f4   : > { %v1733_v40 = vpop.f32.mrf.mxu1 }
 0x7f5   : > { %v3416_v28 = vadd.f32 %v1733_v40, %v1631_v10  ;;  %v1779_v36 = vmul.f32 0.044715, %v3400_v48 }
 0x7f6   : > { %v1735_v5 = vpop.f32.mrf.mxu1 }
 0x7f7   : > { %v3390_v46 = vadd.f32 %v1735_v5, %v1631_v10  ;;  %v1780_v49 = vmul.f32 0.044715, %v3416_v28  ;;  %v1795_v1 = vmul.f32 %v1779_v36, %v3400_v48 }
 0x7f8   : > { %v1739_v29 = vpop.f32.mrf.mxu1 }
 0x7f9   : > { %v1781_v34 = vmul.f32 0.044715, %v3390_v46  ;;  %v3406_v24 = vadd.f32 %v1739_v29, %v1636_v8  ;;  %v1796_v40 = vmul.f32 %v1780_v49, %v3416_v28  ;;  %v1811_v29 = vmul.f32 %v1795_v1, %v3400_v48 }
 0x7fa   : > { %v1741_v53 = vpop.f32.mrf.mxu1  ;;  %v1808_v1 = vmul.f32 %v1792_v19, %v3398_v59 }
 0x7fb   : > { %v3402_v22 = vadd.f32 %v1741_v53, %v1636_v8  ;;  %v1797_v2 = vmul.f32 %v1781_v34, %v3390_v46  ;;  %v1782_v54 = vmul.f32 0.044715, %v3406_v24  ;;  %v1809_v8 = vmul.f32 %v1793_v3, %v3392_v38 }
 0x7fc   : > { %v1743_v11 = vpop.f32.mrf.mxu1  ;;  %v1812_v36 = vmul.f32 %v1796_v40, %v3416_v28  ;;  %v1824_v40 = vadd.f32 %v1808_v1, %v3398_v59 }
 0x7fd   : > { %v1783_v42 = vmul.f32 0.044715, %v3402_v22  ;;  %v3410_v47 = vadd.f32 %v1743_v11, %v1641_v51  ;;  %v1813_v60 = vmul.f32 %v1797_v2, %v3390_v46  ;;  %v1798_v56 = vmul.f32 %v1782_v54, %v3406_v24 }
 0x7fe   : > { %v1745_v39 = vpop.f32.mrf.mxu1 }
 0x7ff   : > { %v1799_v30 = vmul.f32 %v1783_v42, %v3402_v22  ;;  %v1784_v14 = vmul.f32 0.044715, %v3410_v47  ;;  %v3421_v32 = vadd.f32 %v1745_v39, %v1641_v51  ;;  %v1829_v58 = vadd.f32 %v1813_v60, %v3390_v46 }
 0x800   : > { %v1749_v35 = vpop.f32.mrf.mxu1  ;;  %v1814_v41 = vmul.f32 %v1798_v56, %v3406_v24 }
 0x801   : > { %v1815_v23 = vmul.f32 %v1799_v30, %v3402_v22  ;;  %v1800_v55 = vmul.f32 %v1784_v14, %v3410_v47  ;;  %v1785_v20 = vmul.f32 0.044715, %v3421_v32  ;;  %v3435_v15 = vadd.f32 %v1749_v35, %v1646_v63 }
 0x802   : > { %v1751_v7 = vpop.f32.mrf.mxu1  ;;  %v1845_v57 = vmul.f32 0.7978846, %v1829_v58  ;;  %v1827_v35 = vadd.f32 %v1811_v29, %v3400_v48  ;;  %v1825_v58 = vadd.f32 %v1809_v8, %v3392_v38 }
 0x803   : > { %v1801_v21 = vmul.f32 %v1785_v20, %v3421_v32  ;;  %v3440_v0 = vadd.f32 %v1751_v7, %v1646_v63  ;;  %v1786_v51 = vmul.f32 0.044715, %v3435_v15  ;;  %v1816_v6 = vmul.f32 %v1800_v55, %v3410_v47 }
 0x804   : > { %v1753_v61 = vpop.f32.mrf.mxu1  ;;  %v1831_v37 = vadd.f32 %v1815_v23, %v3402_v22  ;;  %v1794_v63 = vmul.f32 %v1778_v33, %v3414_v4  ;;  %v1830_v23 = vadd.f32 %v1814_v41, %v3406_v24  ;;  %2520 = vtanh.f32 %v1845_v57 }
 0x805   : > { %v1817_v52 = vmul.f32 %v1801_v21, %v3421_v32  ;;  %v1787_v10 = vmul.f32 0.044715, %v3440_v0  ;;  %v1802_v27 = vmul.f32 %v1786_v51, %v3435_v15  ;;  %v3454_v5 = vadd.f32 %v1753_v61, %v3386_v25 }
 0x806   : > { %v1755_v31 = vpop.f32.mrf.mxu1  ;;  %v1832_v42 = vadd.f32 %v1816_v6, %v3410_v47  ;;  %v1847_v39 = vmul.f32 0.7978846, %v1831_v37  ;;  %v1810_v3 = vmul.f32 %v1794_v63, %v3414_v4  ;;  %v1828_v21 = vadd.f32 %v1812_v36, %v3416_v28 }
 0x807   : > { %v1803_v34 = vmul.f32 %v1787_v10, %v3440_v0  ;;  %v3459_v62 = vadd.f32 %v1755_v31, %v3386_v25  ;;  %v1833_v53 = vadd.f32 %v1817_v52, %v3421_v32  ;;  %v1818_v2 = vmul.f32 %v1802_v27, %v3435_v15 }
 0x808   : > { %v1788_v11 = vmul.f32 0.044715, %v3454_v5  ;;  %v1848_v33 = vmul.f32 0.7978846, %v1832_v42  ;;  %2522 = vtanh.f32 %v1847_v39  ;;  %v1806_v51 = vmul.f32 %v1790_v13, %v3394_v18 }
 0x809   : > { %v1819_v9 = vmul.f32 %v1803_v34, %v3440_v0  ;;  %v1789_v26 = vmul.f32 0.044715, %v3459_v62  ;;  %v1834_v25 = vadd.f32 %v1818_v2, %v3435_v15  ;;  %v1849_v14 = vmul.f32 0.7978846, %v1833_v53 }
 0x80a   : > { %v1804_v30 = vmul.f32 %v1788_v11, %v3454_v5  ;;  %v1826_v6 = vadd.f32 %v1810_v3, %v3414_v4  ;;  %v1846_v52 = vmul.f32 0.7978846, %v1830_v23  ;;  %v1843_v19 = vmul.f32 0.7978846, %v1827_v35 }
 0x80b   : > { %v1805_v60 = vmul.f32 %v1789_v26, %v3459_v62  ;;  %v1835_v54 = vadd.f32 %v1819_v9, %v3440_v0  ;;  %v1850_v55 = vmul.f32 0.7978846, %v1834_v25  ;;  %2524 = vtanh.f32 %v1849_v14 }
 0x80c   : > { %v1820_v20 = vmul.f32 %v1804_v30, %v3454_v5  ;;  %v1823_v63 = vadd.f32 %v3431_v12, %v3388_v45  ;;  %v1844_v27 = vmul.f32 0.7978846, %v1828_v21  ;;  %v1841_v13 = vmul.f32 0.7978846, %v1825_v58 }
 0x80d   : > { %v1821_v49 = vmul.f32 %v1805_v60, %v3459_v62  ;;  %v1851_v7 = vmul.f32 0.7978846, %v1835_v54  ;;  %v1822_v31 = vadd.f32 %v1806_v51, %v3394_v18  ;;  %v1842_v8 = vmul.f32 0.7978846, %v1826_v6 }
 0x80e   : > { %v1836_v56 = vadd.f32 %v1820_v20, %v3454_v5  ;;  %v1839_v29 = vmul.f32 0.7978846, %v1823_v63  ;;  %v1840_v34 = vmul.f32 0.7978846, %v1824_v40  ;;  %v1772_v25 = vmul.f32 0.5, %v3454_v5 }
 0x80f   : > { %v1837_v61 = vadd.f32 %v1821_v49, %v3459_v62  ;;  %2526 = vtanh.f32 %v1851_v7  ;;  %v1838_v53 = vmul.f32 0.7978846, %v1822_v31  ;;  %v1769_v3 = vmul.f32 0.5, %v3421_v32 }
 0x810   : > { %2528 = vtanh.f32 %v1850_v55  ;;  %v1852_v10 = vmul.f32 0.7978846, %v1836_v56  ;;  %v1771_v54 = vmul.f32 0.5, %v3440_v0  ;;  %v1773_v35 = vmul.f32 0.5, %v3459_v62 }
 0x811   : > { %2530 = vtanh.f32 %v1848_v33  ;;  %v1853_v37 = vmul.f32 0.7978846, %v1837_v61  ;;  %v2521_v41 = vpop.eup %2520  ;;  %v1770_v33 = vmul.f32 0.5, %v3435_v15  ;;  %v1767_v7 = vmul.f32 0.5, %v3402_v22 }
 0x812   : > { %2532 = vtanh.f32 %v1852_v10  ;;  %v1877_v61 = vadd.f32 1.0, %v2521_v41  ;;  %v1768_v0 = vmul.f32 0.5, %v3410_v47  ;;  %v1766_v22 = vmul.f32 0.5, %v3406_v24 }
 0x813   : > { %2534 = vtanh.f32 %v1853_v37  ;;  %v1765_v37 = vmul.f32 0.5, %v3390_v46 }
 0x814   : > { %2536 = vtanh.f32 %v1846_v52 }
 0x815   : > { %2538 = vtanh.f32 %v1843_v19  ;;  %v2523_v12 = vpop.eup %2522 }
 0x816   : > { %2540 = vtanh.f32 %v1844_v27  ;;  %v1879_v55 = vadd.f32 1.0, %v2523_v12 }
 0x817   : > { %2542 = vtanh.f32 %v1841_v13 }
 0x818   : > { %2544 = vtanh.f32 %v1842_v8  ;;  %v2525_v2 = vpop.eup %2524  ;;  %v1895_v10 = vmul.f32 %v1879_v55, %v1767_v7  ;;  %v1763_v8 = vmul.f32 0.5, %v3400_v48  ;;  %v1759_v48 = vmul.f32 0.5, %v3388_v45  ;;  %v2318_v45 = vld [vmem:[%s3546_s1 + $0x48] sm:$0xff]  }
 0x819   : > { %2546 = vtanh.f32 %v1839_v29  ;;  %v1881_v39 = vadd.f32 1.0, %v2525_v2  ;;  %v1893_v29 = vmul.f32 %v1877_v61, %v1765_v37  ;;  %v1761_v2 = vmul.f32 0.5, %v3392_v38 }
 0x81a   : > { %2548 = vtanh.f32 %v1840_v34  ;;  %v1758_v38 = vmul.f32 0.5, %v3394_v18 }
 0x81b   : > { %2550 = vtanh.f32 %v1838_v53  ;;  %v1897_v51 = vmul.f32 %v1881_v39, %v1769_v3  ;;  %v1764_v53 = vmul.f32 0.5, %v3416_v28  ;;  %v1760_v28 = vmul.f32 0.5, %v3398_v59  ;;  %v1913_v59 = vpop.permute.xlu1 %1912 }
 0x81c   : > { %v2527_v11 = vpop.eup %2526 }
 0x81d   : > { %v2529_v57 = vpop.eup %2528  ;;  %v1883_v26 = vadd.f32 1.0, %v2527_v11  ;;  %v1907_v31 = vpack.c.bf16 %v1897_v51, %v1895_v10 }
 0x81e   : > { %v2531_v42 = vpop.eup %2530  ;;  %v1882_v30 = vadd.f32 1.0, %v2529_v57  ;;  %v1762_v57 = vmul.f32 0.5, %v3414_v4 }
 0x81f   : > { %v2533_v9 = vpop.eup %2532  ;;  %v1880_v1 = vadd.f32 1.0, %v2531_v42  ;;  %v1899_v5 = vmul.f32 %v1883_v26, %v1771_v54 }
 0x820   : > { %v2535_v36 = vpop.eup %2534  ;;  %v1884_v14 = vadd.f32 1.0, %v2533_v9  ;;  %v1898_v58 = vmul.f32 %v1882_v30, %v1770_v33 }
 0x821   : > { %v2537_v60 = vpop.eup %2536  ;;  %v1885_v23 = vadd.f32 1.0, %v2535_v36  ;;  %v1896_v40 = vmul.f32 %v1880_v1, %v1768_v0  ;;  %v232_v0 = vld [vmem:[%s3546_s1 + $0x58] sm:$0x3] }
 0x822   : > { %v2539_v20 = vpop.eup %2538  ;;  %v1900_v49 = vmul.f32 %v1884_v14, %v1772_v25  ;;  %v1878_v6 = vadd.f32 1.0, %v2537_v60  ;;  %v233_v10 = vunpack.c.l.bf16 %v232_v0 }
 0x823   : > { %v2541_v21 = vpop.eup %2540  ;;  %v1901_v56 = vmul.f32 %v1885_v23, %v1773_v35  ;;  %v1875_v15 = vadd.f32 1.0, %v2539_v20  ;;  %v1918_v20 = vpop.permute.xlu0 %1917 }
 0x824   : > { %v2543_v32 = vpop.eup %2542  ;;  %v1908_v63 = vpack.c.bf16 %v1900_v49, %v1898_v58  ;;  %v1876_v27 = vadd.f32 1.0, %v2541_v21  ;;  %v1894_v34 = vmul.f32 %v1878_v6, %v1766_v22 }
 0x825   : > { %v2545_v62 = vpop.eup %2544  ;;  %v1909_v52 = vpack.c.bf16 %v1901_v56, %v1899_v5  ;;  %v1873_v47 = vadd.f32 1.0, %v2543_v32  ;;  %v1891_v12 = vmul.f32 %v1875_v15, %v1763_v8 }
 0x826   : > { %v2547_v19 = vpop.eup %2546  ;;  %v1874_v41 = vadd.f32 1.0, %v2545_v62  ;;  %v1906_v11 = vpack.c.bf16 %v1896_v40, %v1894_v34  ;;  %v1892_v42 = vmul.f32 %v1876_v27, %v1764_v53 }
 0x827   : > { %v2549_v13 = vpop.eup %2548  ;;  %1937 = vmatprep.subr.bf16.mxu0 %v1909_v52  ;;  %v1871_v24 = vadd.f32 1.0, %v2547_v19  ;;  %v1905_v26 = vpack.c.bf16 %v1893_v29, %v1891_v12  ;;  %v1889_v39 = vmul.f32 %v1873_v47, %v1761_v2  ;;  %v256_v47 = vld [vmem:[%s3547_s2 + $0xb0] sm:$0x7] }
 0x828   : > { %1938 = vmatpush1.bf16.msra.mxu0 %v1908_v63  ;;  %v2551_v46 = vpop.eup %2550  ;;  %v1872_v9 = vadd.f32 1.0, %v2549_v13  ;;  %v1890_v36 = vmul.f32 %v1874_v41, %v1762_v57 }
 0x829   : > { %1939 = vmatprep.subr.bf16.mxu0 %v1907_v31  ;;  %v1870_v25 = vadd.f32 1.0, %v2551_v46  ;;  %v1887_v30 = vmul.f32 %v1871_v24, %v1759_v48 }
 0x82a   : > { %v1904_v14 = vpack.c.bf16 %v1892_v42, %v1890_v36  ;;  %v1888_v3 = vmul.f32 %v1872_v9, %v1760_v28 }
 0x82b   : > { %v1903_v60 = vpack.c.bf16 %v1889_v39, %v1887_v30  ;;  %v1886_v4 = vmul.f32 %v1870_v25, %v1758_v38 }
 0x82c   : > { %1940 = vmatpush1.bf16.msra.mxu0 %v1906_v11 }
 0x82d   : > { %1941 = vmatprep.subr.bf16.mxu0 %v1905_v26  ;;  %v1902_v54 = vpack.c.bf16 %v1888_v3, %v1886_v4 }
 0x830   : > { %1942 = vmatpush1.bf16.msra.mxu0 %v1904_v14 }
 0x831   : > { %1943 = vmatprep.subr.bf16.mxu0 %v1903_v60 }
 0x834   : > { %1944 = vmatpush1.bf16.msra.mxu0 %v1902_v54 }
 0x837   : > { %2277 = vmatmul.mubr.msk.bf16.vlgmr.msra.gmra.mxu0 %vm1925_vm8, %v2318_v45 }
 0x838   : > { %2028 = vmatprep.mubr.bf16.mxu0 %v3642_v50 }
 0x8f7   : > { %v1963_v35 = vpop.f32.mrf.mxu0 }
 0x8f8   : > { %v1964_v23 = vadd.f32 %v1963_v35, %v1913_v59 }
 0x8f9   : > { %v1965_v55 = vpop.f32.mrf.mxu0 }
 0x8fa   : > { %v1966_v18 = vadd.f32 %v1965_v55, %v1913_v59  ;;  %v1972_v49 = vadd.f32 %v1964_v23, %v3348_v17  ;;  %v2319_v17 = vld [vmem:[%s3546_s1 + $0x50] sm:$0x1f]  }
 0x8fb   : > { %v1967_v33 = vpop.f32.mrf.mxu0 }
 0x8fc   : > { %v1973_v7 = vadd.f32 %v1966_v18, %v3354_v16  ;;  %v1968_v1 = vadd.f32 %v1967_v33, %v1918_v20  ;;  %v255_v16 = vld [vmem:[%s3547_s2 + $0xa8] sm:$0x1] }
 0x8fd   : > { %v1969_v21 = vpop.f32.mrf.mxu0 }
 0x8fe   : > { %v1970_v5 = vadd.f32 %v1969_v21, %v1918_v20  ;;  %v2043_v56 = vadd.f32 %v1973_v7, %v1972_v49  ;;  %v1974_v51 = vadd.f32 %v1968_v1, %v3351_v44  ;;  %v2566_v44 = vmov 0.0  }
 0x900   : > { %v1975_v61 = vadd.f32 %v1970_v5, %v3359_v43  ;;  %2044 = vadd.xlane.f32.xlu1 %v2043_v56  ;;  %v1976_v58 = vpack.c.bf16 %v1974_v51, %v1972_v49  ;;  %v254_v43 = vld [vmem:[%s3547_s2 + $0xa0] sm:$0xff] }
 0x902   : > { %v2046_v50 = vadd.f32 %v1975_v61, %v1974_v51  ;;  %v1977_v32 = vpack.c.bf16 %v1975_v61, %v1973_v7 }
 0x904   : > { %2047 = vadd.xlane.f32.xlu0 %v2046_v50  ;;  %2010 = vmatprep.subr.bf16.mxu0 %v1977_v32 }
 0x905   : > { %2011 = vmatpush1.bf16.msra.mxu0 %v1976_v58 }
 0x906   : > { %2288 = vmatprep.subr.mxu0 %v2566_v44 }
 0x908   : > { %2279 = vmatmul.mubr.msk.bf16.vlgmr.msra.gmra.mxu0 %vm431_vm7, %v2319_v17 }
 0x909   : > { %2292 = vmatprep.mubr.msk.f32.mxu0 %vm2567_vm9, %v2566_v44 }
 0x911   : > { %1985 = vperm.xlu1 %2308, %v255_v16  }
 0x91a   : > { %1980 = vperm.xlu0 %2307, %v254_v43  }
 0x989   : > { %v2045_v6 = vpop.xlane.xlu1 %2044 }
 0x98a   : > { %v2050_v37 = vmul.f32 0.00390625, %v2045_v6 }
 0x98d   : > { %v2048_v62 = vpop.xlane.xlu0 %2047  ;;  %v1986_v27 = vpop.permute.xlu1 %1985 }
 0x98e   : > { %v2051_v52 = vmul.f32 0.00390625, %v2048_v62 }
 0x990   : > { %2289 = vmatpush3.msra.mxu0 %v2051_v52 }
 0x991   : > { %2290 = vmatprep.subr.mxu0 %v2566_v44 }
 0x992   : > { %2291 = vmatpush3.msra.mxu0 %v2050_v37 }
 0x993   : > { %2293 = vmatmul.mubr.msk.f32.vlgmr.msra.gmra.mxu0 %vm431_vm7, %v233_v10 }
 0x995   : > { %v1981_v15 = vpop.permute.xlu0 %1980 }
 0x9c8   : > { %v2030_v19 = vpop.f32.mrf.mxu0 }
 0x9c9   : > { %v2031_v63 = vadd.f32 %v2030_v19, %v1981_v15 }
 0x9ca   : > { %v2032_v22 = vpop.f32.mrf.mxu0 }
 0x9cb   : > { %2039 = vst [vmem:[%s204_s21] sm:$0xff] %v2031_v63  ;;  %v2033_v40 = vadd.f32 %v2032_v22, %v1981_v15 }
 0x9cc   : > { %v2034_v13 = vpop.f32.mrf.mxu0 }
 0x9cd   : > { %2040 = vst [vmem:[%s204_s21 + $0x8] sm:$0xff] %v2033_v40  ;;  %v2035_v31 = vadd.f32 %v2034_v13, %v1986_v27 }
 0x9ce   : > { %v2036_v8 = vpop.f32.mrf.mxu0 }
 0x9cf   : > { %2041 = vst [vmem:[%s204_s21 + $0x10] sm:$0x1] %v2035_v31  ;;  %v2037_v29 = vadd.f32 %v2036_v8, %v1986_v27 }
 0x9d1   : > { %2042 = vst [vmem:[%s204_s21 + $0x18] sm:$0x1] %v2037_v29 }
 0xa53   : > { %v2121_v34 = vpop.f32.mrf.mxu0 }
 0xa54   : > { %v2122_v53 = vadd.f32 %v2121_v34, %v256_v47 }
 0xa55   : > { %v2294_v41 = vpop.f32.mrf.mxu0 }
 0xa56   : > { %v2126_v46 = vsel %vm2125_vm10, %v2122_v53, -inf }
 0xa57   : > { %v2127_v12 = vrot.slane %v2126_v46, 4 }
 0xa59   : > { %v2128_v2 = vmax.f32 %v2126_v46, %v2127_v12 }
 0xa5b   : > { %v2129_v24 = vrot.slane %v2128_v2, 2 }
 0xa5d   : > { %v2130_v11 = vmax.f32 %v2128_v2, %v2129_v24 }
 0xa5f   : > { %v2131_v57 = vrot.slane %v2130_v11, 1 }
 0xa61   : > { %v2132_v42 = vmax.f32 %v2130_v11, %v2131_v57 }
 0xa63   : > { %v2133_v9 = vsub.f32 %v2122_v53, %v2132_v42 }
 0xa65   : > { %v2134_v26 = vmul.f32 1.442695, %v2133_v9 }
 0xa67   : > { %2552 = vpow2.f32 %v2134_v26 }
 0xa74   : > { %v2553_v48 = vpop.eup %2552 }
 0xa75   : > { %v2136_v39 = vsel %vm2125_vm10, %v2553_v48, 0.0 }
 0xa76   : > { %v2137_v36 = vrot.slane %v2136_v39, 4 }
 0xa78   : > { %v2138_v28 = vadd.f32 %v2137_v36, %v2136_v39 }
 0xa7a   : > { %v2139_v25 = vrot.slane %v2138_v28, 2 }
 0xa7c   : > { %v2140_v30 = vadd.f32 %v2139_v25, %v2138_v28 }
 0xa7e   : > { %v2141_v14 = vrot.slane %v2140_v30, 1 }
 0xa80   : > { %v2142_v38 = vadd.f32 %v2141_v14, %v2140_v30 }
 0xa82   : > { %2554 = vrcp.f32 %v2142_v38 }
 0xa8f   : > { %v2555_v3 = vpop.eup %2554 }
 0xa90   : > { %v2144_v60 = vmul.f32 %v2555_v3, %v2553_v48 }
 0xa92   : > { %2145 = vst.msk [vmem:[%s208_s27] sm:$0x7] %vm2125_vm10, %v2144_v60 }
 0xa93 PF: > { %s15_s15 = sadd.s32 1, %s2562_s15  }
 0xa94   : > { %p12_p4 = scmp.ge.s32.totalorder %s15_s15, 4  }
 0xa96   :  { %14 = sbr.rel (!%p12_p4) target bundleno = 1 (0x1), region = 74 }

</bundles_post_ra>
